<compile_context>
chip_gen: v7x
topology: tpu7x:2x2x1
jax: 0.10.0
libtpu: 0.0.40
codegen_flags: <defaults>
</compile_context>

<pallas_src>
import math
import jax
import jax.numpy as jnp
from jax.experimental import pallas as pl
from jax.experimental.pallas import tpu as pltpu

# ---- small synthetic BERT config ----
VOCAB = 30
TYPE_VOCAB = 2
MAX_POS = 16
HIDDEN = 32
HEADS = 4
DH = HIDDEN // HEADS
INTER = 64
LAYERS = 2
NUM_LABELS = 5
LPAD = 128            # lane-dense padded label dim for classifier / CE / logits store
EPS = 1e-12
NEG_INF = -1e9


def _layernorm(x, g, b):
    mu = jnp.mean(x, axis=-1, keepdims=True)
    var = jnp.mean((x - mu) ** 2, axis=-1, keepdims=True)
    return (x - mu) * jax.lax.rsqrt(var + EPS) * g + b


def _mxu(a, w):
    # bf16 operands on the MXU (weights already bf16 in HBM), f32 accumulation.
    return jnp.dot(a.astype(jnp.bfloat16), w, preferred_element_type=jnp.float32)


def _erf(x):
    # Abramowitz & Stegun 7.1.26 (|err| < 1.5e-7): keeps HF's exact erf-GELU
    # semantics using only exp/mul/div (guaranteed Mosaic lowerings).
    a1, a2, a3 = 0.254829592, -0.284496736, 1.421413741
    a4, a5, p = -1.453152027, 1.061405429, 0.3275911
    sgn = jnp.where(x >= 0.0, 1.0, -1.0)
    ax = jnp.abs(x)
    t = 1.0 / (1.0 + p * ax)
    poly = ((((a5 * t + a4) * t + a3) * t + a2) * t + a1) * t
    return sgn * (1.0 - poly * jnp.exp(-ax * ax))


def _gelu(x):
    return 0.5 * x * (1.0 + _erf(x * 0.7071067811865476))


def _make_fused_kernel(S):
    """Fused per-(batch-tile, layer) kernel body."""

    def kernel(emb_ref, bias_ref, labels_ref,
               eln_g_ref, eln_b_ref,
               wqkv_ref, bqkv_ref, wo_ref, bo_ref, ln1_g_ref, ln1_b_ref,
               w1_ref, b1_ref, w2_ref, b2_ref, ln2_g_ref, ln2_b_ref,
               clsw_ref, clsb_ref,
               logits_ref, nll_ref,
               x_ref):
        l = pl.program_id(1)

        # ---- layer 0: embedding LayerNorm into the persistent VMEM activation
        @pl.when(l == 0)
        def _():
            x_ref[...] = _layernorm(emb_ref[0], eln_g_ref[...], eln_b_ref[...])

        x = x_ref[...]                                             # (S, H) f32

        # ---- self-attention (head-batched) ----
        qkv = _mxu(x, wqkv_ref[0]) + bqkv_ref[0]                   # (S, 3H); Q pre-scaled at init
        q = jnp.stack([qkv[:, h * DH:(h + 1) * DH]
                       for h in range(HEADS)], axis=0)             # (HEADS, S, DH)
        k = jnp.stack([qkv[:, HIDDEN + h * DH:HIDDEN + (h + 1) * DH]
                       for h in range(HEADS)], axis=0)
        v = jnp.stack([qkv[:, 2 * HIDDEN + h * DH:2 * HIDDEN + (h + 1) * DH]
                       for h in range(HEADS)], axis=0)

        # one batched MXU call for all heads' scores
        s = jax.lax.dot_general(q.astype(jnp.bfloat16), k.astype(jnp.bfloat16),
                                (((2,), (2,)), ((0,), (0,))),
                                preferred_element_type=jnp.float32)  # (HEADS, S, S)
        s = s + bias_ref[...]                                        # mask bias (1,1,S), once
        m = jnp.max(s, axis=-1, keepdims=True)
        p = jnp.exp(s - m)
        p = p / jnp.sum(p, axis=-1, keepdims=True)                   # exact softmax
        ctx = jax.lax.dot_general(p.astype(jnp.bfloat16), v.astype(jnp.bfloat16),
                                  (((2,), (1,)), ((0,), (0,))),
                                  preferred_element_type=jnp.float32)  # (HEADS, S, DH)
        # merge heads back to lane-contiguous (S, HIDDEN)
        ctx2d = jnp.concatenate([ctx[h] for h in range(HEADS)], axis=1)

        # single K=HIDDEN output projection + residual + LN
        attn = _mxu(ctx2d, wo_ref[0]) + bo_ref[0]
        x = _layernorm(attn + x, ln1_g_ref[0], ln1_b_ref[0])

        # ---- FFN (exact erf-GELU) + residual + LN ----
        h1 = _gelu(_mxu(x, w1_ref[0]) + b1_ref[0])                 # (S, INTER)
        h2 = _mxu(h1, w2_ref[0]) + b2_ref[0]                       # (S, H)
        x = _layernorm(h2 + x, ln2_g_ref[0], ln2_b_ref[0])
        x_ref[...] = x

        # TODO(synk): at real BERT shapes (S=512, HIDDEN=768) add row tiling and
        # flash-style streaming over K/V tiles instead of the full SxS scores.

        # ---- last layer: classifier (lane-dense LPAD) + per-token cross-entropy
        @pl.when(l == pl.num_programs(1) - 1)
        def _():
            logits = _mxu(x, clsw_ref[...]) + clsb_ref[...]        # (S, LPAD); pad cols ~ -1e9
            logits_ref[0] = logits
            mm = jnp.max(logits, axis=-1, keepdims=True)
            lse = jnp.log(jnp.sum(jnp.exp(logits - mm), axis=-1, keepdims=True)) + mm
            onehot = (jax.lax.broadcasted_iota(jnp.int32, (S, LPAD), 1)
                      == labels_ref[0]).astype(jnp.float32)
            nll_ref[0] = jnp.sum(onehot * (lse - logits), axis=-1, keepdims=True)

    return kernel


# ---------------- parameter init (deterministic, synthetic) ----------------

def init_params(key):
    def nrm(k, shape):
        return 0.02 * jax.random.normal(k, shape, dtype=jnp.float32)

    keys = jax.random.split(key, 8 + LAYERS)
    scale = 1.0 / math.sqrt(DH)

    cls_w = jnp.zeros((HIDDEN, LPAD), jnp.float32).at[:, :NUM_LABELS].set(
        nrm(keys[3], (HIDDEN, NUM_LABELS)))
    cls_b = jnp.full((1, LPAD), NEG_INF, jnp.float32).at[:, :NUM_LABELS].set(0.0)

    p = {
        "word_emb": nrm(keys[0], (VOCAB, HIDDEN)),
        "pos_emb": nrm(keys[1], (MAX_POS, HIDDEN)),
        "type_emb": nrm(keys[2], (TYPE_VOCAB, HIDDEN)),
        "emb_ln_g": jnp.ones((1, HIDDEN), jnp.float32),
        "emb_ln_b": jnp.zeros((1, HIDDEN), jnp.float32),
        "cls_w": cls_w.astype(jnp.bfloat16),     # bf16 weights in HBM
        "cls_b": cls_b,                          # f32 bias carries the -1e9 lane pads
    }

    wqkv, bqkv, wo, bo = [], [], [], []
    ln1_g, ln1_b, w1, b1, w2, b2, ln2_g, ln2_b = [], [], [], [], [], [], [], []
    for l in range(LAYERS):
        lk = jax.random.split(keys[8 + l], 6)
        wq = nrm(lk[0], (HIDDEN, HIDDEN)) * scale        # fold 1/sqrt(DH) into Q weights
        wk = nrm(lk[1], (HIDDEN, HIDDEN))
        wv = nrm(lk[2], (HIDDEN, HIDDEN))
        wqkv.append(jnp.concatenate([wq, wk, wv], axis=1))       # (H, 3H)
        bqkv.append(jnp.zeros((1, 3 * HIDDEN), jnp.float32))     # (Q bias would also be *scale)
        wo.append(nrm(lk[3], (HIDDEN, HIDDEN)))
        bo.append(jnp.zeros((1, HIDDEN), jnp.float32))
        ln1_g.append(jnp.ones((1, HIDDEN), jnp.float32))
        ln1_b.append(jnp.zeros((1, HIDDEN), jnp.float32))
        w1.append(nrm(lk[4], (HIDDEN, INTER)))
        b1.append(jnp.zeros((1, INTER), jnp.float32))
        w2.append(nrm(lk[5], (INTER, HIDDEN)))
        b2.append(jnp.zeros((1, HIDDEN), jnp.float32))
        ln2_g.append(jnp.ones((1, HIDDEN), jnp.float32))
        ln2_b.append(jnp.zeros((1, HIDDEN), jnp.float32))

    p.update({
        "wqkv": jnp.stack(wqkv).astype(jnp.bfloat16), "bqkv": jnp.stack(bqkv),
        "wo": jnp.stack(wo).astype(jnp.bfloat16), "bo": jnp.stack(bo),
        "ln1_g": jnp.stack(ln1_g), "ln1_b": jnp.stack(ln1_b),
        "w1": jnp.stack(w1).astype(jnp.bfloat16), "b1": jnp.stack(b1),
        "w2": jnp.stack(w2).astype(jnp.bfloat16), "b2": jnp.stack(b2),
        "ln2_g": jnp.stack(ln2_g), "ln2_b": jnp.stack(ln2_b),
    })
    return p


# ---------------- model forward (gather glue in JAX, the rest fused) ----------------

def bert_token_classification_forward(params, input_ids, mask, labels):
    B, S = input_ids.shape
    pos_ids = jnp.arange(S, dtype=jnp.int32)
    token_type_ids = jnp.zeros((B, S), dtype=jnp.int32)

    # Embedding gather is glue (data-dependent lookup); everything downstream is
    # one fused, pipelined Pallas kernel.
    emb = (jnp.take(params["word_emb"], input_ids, axis=0)
           + jnp.take(params["pos_emb"], pos_ids, axis=0)[None, :, :]
           + jnp.take(params["type_emb"], token_type_ids, axis=0))          # (B,S,H) f32
    bias = ((1.0 - mask.astype(jnp.float32)) * NEG_INF).reshape(B, 1, S)    # additive mask bias
    labels3 = labels.reshape(B, S, 1).astype(jnp.int32)
    # TODO(synk): dropout omitted (eval-mode identity).

    kernel = _make_fused_kernel(S)

    def batch_spec(a):
        nd = a.ndim
        return pl.BlockSpec((1,) + a.shape[1:], lambda b, l, _n=nd: (b,) + (0,) * (_n - 1))

    def layer_spec(a):
        nd = a.ndim
        return pl.BlockSpec((1,) + a.shape[1:], lambda b, l, _n=nd: (l,) + (0,) * (_n - 1))

    def const_spec(a):
        nd = a.ndim
        return pl.BlockSpec(a.shape, lambda b, l, _n=nd: (0,) * _n)

    in_arrays = (emb, bias, labels3,
                 params["emb_ln_g"], params["emb_ln_b"],
                 params["wqkv"], params["bqkv"], params["wo"], params["bo"],
                 params["ln1_g"], params["ln1_b"],
                 params["w1"], params["b1"], params["w2"], params["b2"],
                 params["ln2_g"], params["ln2_b"],
                 params["cls_w"], params["cls_b"])

    in_specs = ([batch_spec(emb), batch_spec(bias), batch_spec(labels3),
                 const_spec(params["emb_ln_g"]), const_spec(params["emb_ln_b"])]
                + [layer_spec(params[n]) for n in
                   ("wqkv", "bqkv", "wo", "bo", "ln1_g", "ln1_b",
                    "w1", "b1", "w2", "b2", "ln2_g", "ln2_b")]
                + [const_spec(params["cls_w"]), const_spec(params["cls_b"])])

    logits_pad, nll = pl.pallas_call(
        kernel,
        out_shape=(jax.ShapeDtypeStruct((B, S, LPAD), jnp.float32),
                   jax.ShapeDtypeStruct((B, S, 1), jnp.float32)),
        grid_spec=pltpu.PrefetchScalarGridSpec(
            num_scalar_prefetch=0,
            grid=(B, LAYERS),                       # batch tiles x layers
            in_specs=in_specs,
            out_specs=(pl.BlockSpec((1, S, LPAD), lambda b, l: (b, 0, 0)),
                       pl.BlockSpec((1, S, 1), lambda b, l: (b, 0, 0))),
            scratch_shapes=[pltpu.VMEM((S, HIDDEN), jnp.float32)]),   # activation carry
        compiler_params=pltpu.CompilerParams(
            dimension_semantics=("parallel", "arbitrary"),
            vmem_limit_bytes=64 * 1024 * 1024),
    )(*in_arrays)

    # HF CrossEntropyLoss(mean) over all token positions.
    # TODO(synk): no -100 (ignore-index) label masking, same as the previous version.
    loss = jnp.sum(nll) / (B * S)
    logits = logits_pad[:, :, :NUM_LABELS]
    return loss, logits


# ---------------- main ----------------

if __name__ == "__main__":
    key = jax.random.PRNGKey(0)
    pkey, ikey, lkey = jax.random.split(key, 3)

    params = init_params(pkey)

    B, S = 2, 8
    input_ids = jax.random.randint(ikey, (B, S), 0, VOCAB, dtype=jnp.int32)
    mask = jnp.ones((B, S), dtype=jnp.int32).at[1, 6:].set(0)   # a couple of padded positions
    labels = jax.random.randint(lkey, (B, S), 0, NUM_LABELS, dtype=jnp.int32)

    loss, logits = jax.jit(bert_token_classification_forward)(params, input_ids, mask, labels)
    jax.block_until_ready((loss, logits))

    assert logits.shape == (B, S, NUM_LABELS)
    assert logits.dtype == jnp.float32
    assert loss.shape == () and bool(jnp.isfinite(loss))
    print("KERNEL_OK")
</pallas_src>

<mosaic_0001>
module attributes {stable_mosaic.version = 11 : i64} {
  func.func @kernel(%arg0: i32, %arg1: i32, %arg2: memref<1x8x32xf32, #tpu.memory_space<vmem>>, %arg3: memref<1x1x8xf32, #tpu.memory_space<vmem>>, %arg4: memref<1x8x1xi32, #tpu.memory_space<vmem>>, %arg5: memref<1x32xf32, #tpu.memory_space<vmem>>, %arg6: memref<1x32xf32, #tpu.memory_space<vmem>>, %arg7: memref<1x32x96xbf16, #tpu.memory_space<vmem>>, %arg8: memref<1x1x96xf32, #tpu.memory_space<vmem>>, %arg9: memref<1x32x32xbf16, #tpu.memory_space<vmem>>, %arg10: memref<1x1x32xf32, #tpu.memory_space<vmem>>, %arg11: memref<1x1x32xf32, #tpu.memory_space<vmem>>, %arg12: memref<1x1x32xf32, #tpu.memory_space<vmem>>, %arg13: memref<1x32x64xbf16, #tpu.memory_space<vmem>>, %arg14: memref<1x1x64xf32, #tpu.memory_space<vmem>>, %arg15: memref<1x64x32xbf16, #tpu.memory_space<vmem>>, %arg16: memref<1x1x32xf32, #tpu.memory_space<vmem>>, %arg17: memref<1x1x32xf32, #tpu.memory_space<vmem>>, %arg18: memref<1x1x32xf32, #tpu.memory_space<vmem>>, %arg19: memref<32x128xbf16, #tpu.memory_space<vmem>>, %arg20: memref<1x128xf32, #tpu.memory_space<vmem>>, %arg21: memref<1x8x128xf32, #tpu.memory_space<vmem>>, %arg22: memref<1x8x1xf32, #tpu.memory_space<vmem>>, %arg23: memref<8x32xf32, #tpu.memory_space<vmem>>) attributes {dimension_semantics = [#tpu.dimension_semantics<parallel>, #tpu.dimension_semantics<arbitrary>], iteration_bounds = array<i64: 2, 2>, scalar_prefetch = 0 : i64, scratch_operands = 1 : i64, tpu.core_type = #tpu.core_type<tc>, window_params = [{transform_indices = @transform_0, window_bounds = array<i64: 1, 8, 32>}, {transform_indices = @transform_1, window_bounds = array<i64: 1, 1, 8>}, {transform_indices = @transform_2, window_bounds = array<i64: 1, 8, 1>}, {pipeline_mode = #tpu.pipeline_mode<synchronous>, transform_indices = @transform_3, window_bounds = array<i64: 1, 32>}, {pipeline_mode = #tpu.pipeline_mode<synchronous>, transform_indices = @transform_4, window_bounds = array<i64: 1, 32>}, {transform_indices = @transform_5, window_bounds = array<i64: 1, 32, 96>}, {transform_indices = @transform_6, window_bounds = array<i64: 1, 1, 96>}, {transform_indices = @transform_7, window_bounds = array<i64: 1, 32, 32>}, {transform_indices = @transform_8, window_bounds = array<i64: 1, 1, 32>}, {transform_indices = @transform_9, window_bounds = array<i64: 1, 1, 32>}, {transform_indices = @transform_10, window_bounds = array<i64: 1, 1, 32>}, {transform_indices = @transform_11, window_bounds = array<i64: 1, 32, 64>}, {transform_indices = @transform_12, window_bounds = array<i64: 1, 1, 64>}, {transform_indices = @transform_13, window_bounds = array<i64: 1, 64, 32>}, {transform_indices = @transform_14, window_bounds = array<i64: 1, 1, 32>}, {transform_indices = @transform_15, window_bounds = array<i64: 1, 1, 32>}, {transform_indices = @transform_16, window_bounds = array<i64: 1, 1, 32>}, {pipeline_mode = #tpu.pipeline_mode<synchronous>, transform_indices = @transform_17, window_bounds = array<i64: 32, 128>}, {pipeline_mode = #tpu.pipeline_mode<synchronous>, transform_indices = @transform_18, window_bounds = array<i64: 1, 128>}, {transform_indices = @transform_19, window_bounds = array<i64: 1, 8, 128>}, {transform_indices = @transform_20, window_bounds = array<i64: 1, 8, 1>}]} {
    %c0_i32 = arith.constant 0 : i32
    %0 = arith.cmpi eq, %arg1, %c0_i32 : i32
    %1 = arith.extui %0 : i1 to i32
    %c0_i32_0 = arith.constant 0 : i32
    %2 = arith.cmpi ne, %1, %c0_i32_0 : i32
    scf.if %2 {
      %c0_77 = arith.constant 0 : index
      %c0_78 = arith.constant 0 : index
      %c0_79 = arith.constant 0 : index
      %189 = vector.load %arg2[%c0_77, %c0_78, %c0_79] : memref<1x8x32xf32, #tpu.memory_space<vmem>>, vector<1x8x32xf32>
      %190 = vector.shape_cast %189 : vector<1x8x32xf32> to vector<8x32xf32>
      %c0_80 = arith.constant 0 : index
      %c0_81 = arith.constant 0 : index
      %191 = vector.load %arg5[%c0_80, %c0_81] : memref<1x32xf32, #tpu.memory_space<vmem>>, vector<1x32xf32>
      %c0_82 = arith.constant 0 : index
      %c0_83 = arith.constant 0 : index
      %192 = vector.load %arg6[%c0_82, %c0_83] : memref<1x32xf32, #tpu.memory_space<vmem>>, vector<1x32xf32>
      %cst_84 = arith.constant dense<0.000000e+00> : vector<8xf32>
      %193 = vector.multi_reduction <add>, %190, %cst_84 [1] : vector<8x32xf32> to vector<8xf32>
      %194 = vector.shape_cast %193 : vector<8xf32> to vector<8x1xf32>
      %cst_85 = arith.constant 3.200000e+01 : f32
      %195 = vector.broadcast %cst_85 : f32 to vector<8x1xf32>
      %196 = arith.divf %194, %195 : vector<8x1xf32>
      %197 = vector.broadcast %196 : vector<8x1xf32> to vector<8x32xf32>
      %198 = arith.subf %190, %197 : vector<8x32xf32>
      %199 = arith.mulf %198, %198 : vector<8x32xf32>
      %cst_86 = arith.constant dense<0.000000e+00> : vector<8xf32>
      %200 = vector.multi_reduction <add>, %199, %cst_86 [1] : vector<8x32xf32> to vector<8xf32>
      %201 = vector.shape_cast %200 : vector<8xf32> to vector<8x1xf32>
      %cst_87 = arith.constant 3.200000e+01 : f32
      %202 = vector.broadcast %cst_87 : f32 to vector<8x1xf32>
      %203 = arith.divf %201, %202 : vector<8x1xf32>
      %204 = vector.broadcast %196 : vector<8x1xf32> to vector<8x32xf32>
      %205 = arith.subf %190, %204 : vector<8x32xf32>
      %cst_88 = arith.constant 9.99999996E-13 : f32
      %206 = vector.broadcast %cst_88 : f32 to vector<8x1xf32>
      %207 = arith.addf %203, %206 : vector<8x1xf32>
      %208 = math.rsqrt %207 : vector<8x1xf32>
      %209 = vector.broadcast %208 : vector<8x1xf32> to vector<8x32xf32>
      %210 = arith.mulf %205, %209 : vector<8x32xf32>
      %211 = vector.broadcast %191 : vector<1x32xf32> to vector<8x32xf32>
      %212 = arith.mulf %210, %211 : vector<8x32xf32>
      %213 = vector.broadcast %192 : vector<1x32xf32> to vector<8x32xf32>
      %214 = arith.addf %212, %213 : vector<8x32xf32>
      %c0_89 = arith.constant 0 : index
      %c0_90 = arith.constant 0 : index
      %215 = vector.load %arg23[%c0_89, %c0_90] : memref<8x32xf32, #tpu.memory_space<vmem>>, vector<8x32xf32>
      tpu.vector_store %arg23[%c0_89, %c0_90], %214 {strides = array<i32>} : memref<8x32xf32, #tpu.memory_space<vmem>>, vector<8x32xf32>,
    } else {
    }
    %c0 = arith.constant 0 : index
    %c0_1 = arith.constant 0 : index
    %3 = vector.load %arg23[%c0, %c0_1] : memref<8x32xf32, #tpu.memory_space<vmem>>, vector<8x32xf32>
    %c0_2 = arith.constant 0 : index
    %c0_3 = arith.constant 0 : index
    %c0_4 = arith.constant 0 : index
    %4 = vector.load %arg7[%c0_2, %c0_3, %c0_4] : memref<1x32x96xbf16, #tpu.memory_space<vmem>>, vector<1x32x96xbf16>
    %5 = vector.shape_cast %4 : vector<1x32x96xbf16> to vector<32x96xbf16>
    %6 = arith.truncf %3 : vector<8x32xf32> to vector<8x32xbf16>
    %cst = arith.constant dense<0.000000e+00> : vector<8x96xf32>
    %7 = tpu.matmul %6, %5, %cst {dimension_numbers = #tpu.dot_dimension_numbers<[1], [0], [0], [1], [0, 0, 1, 1], [], []>} : vector<8x32xbf16>, vector<32x96xbf16>, vector<8x96xf32> -> vector<8x96xf32>
    %c0_5 = arith.constant 0 : index
    %c0_6 = arith.constant 0 : index
    %c0_7 = arith.constant 0 : index
    %8 = vector.load %arg8[%c0_5, %c0_6, %c0_7] : memref<1x1x96xf32, #tpu.memory_space<vmem>>, vector<1x1x96xf32>
    %9 = vector.shape_cast %8 : vector<1x1x96xf32> to vector<1x96xf32>
    %10 = vector.broadcast %9 : vector<1x96xf32> to vector<8x96xf32>
    %11 = arith.addf %7, %10 : vector<8x96xf32>
    %12 = vector.extract_strided_slice %11 {offsets = [0, 0], sizes = [8, 8], strides = [1, 1]} : vector<8x96xf32> to vector<8x8xf32>
    %13 = vector.extract_strided_slice %11 {offsets = [0, 8], sizes = [8, 8], strides = [1, 1]} : vector<8x96xf32> to vector<8x8xf32>
    %14 = vector.extract_strided_slice %11 {offsets = [0, 16], sizes = [8, 8], strides = [1, 1]} : vector<8x96xf32> to vector<8x8xf32>
    %15 = vector.extract_strided_slice %11 {offsets = [0, 24], sizes = [8, 8], strides = [1, 1]} : vector<8x96xf32> to vector<8x8xf32>
    %16 = vector.shape_cast %12 : vector<8x8xf32> to vector<1x8x8xf32>
    %17 = vector.shape_cast %13 : vector<8x8xf32> to vector<1x8x8xf32>
    %18 = vector.shape_cast %14 : vector<8x8xf32> to vector<1x8x8xf32>
    %19 = vector.shape_cast %15 : vector<8x8xf32> to vector<1x8x8xf32>
    %20 = tpu.concatenate %16, %17, %18, %19 in 0 : vector<1x8x8xf32>, vector<1x8x8xf32>, vector<1x8x8xf32>, vector<1x8x8xf32> -> vector<4x8x8xf32>
    %21 = vector.extract_strided_slice %11 {offsets = [0, 32], sizes = [8, 8], strides = [1, 1]} : vector<8x96xf32> to vector<8x8xf32>
    %22 = vector.extract_strided_slice %11 {offsets = [0, 40], sizes = [8, 8], strides = [1, 1]} : vector<8x96xf32> to vector<8x8xf32>
    %23 = vector.extract_strided_slice %11 {offsets = [0, 48], sizes = [8, 8], strides = [1, 1]} : vector<8x96xf32> to vector<8x8xf32>
    %24 = vector.extract_strided_slice %11 {offsets = [0, 56], sizes = [8, 8], strides = [1, 1]} : vector<8x96xf32> to vector<8x8xf32>
    %25 = vector.shape_cast %21 : vector<8x8xf32> to vector<1x8x8xf32>
    %26 = vector.shape_cast %22 : vector<8x8xf32> to vector<1x8x8xf32>
    %27 = vector.shape_cast %23 : vector<8x8xf32> to vector<1x8x8xf32>
    %28 = vector.shape_cast %24 : vector<8x8xf32> to vector<1x8x8xf32>
    %29 = tpu.concatenate %25, %26, %27, %28 in 0 : vector<1x8x8xf32>, vector<1x8x8xf32>, vector<1x8x8xf32>, vector<1x8x8xf32> -> vector<4x8x8xf32>
    %30 = vector.extract_strided_slice %11 {offsets = [0, 64], sizes = [8, 8], strides = [1, 1]} : vector<8x96xf32> to vector<8x8xf32>
    %31 = vector.extract_strided_slice %11 {offsets = [0, 72], sizes = [8, 8], strides = [1, 1]} : vector<8x96xf32> to vector<8x8xf32>
    %32 = vector.extract_strided_slice %11 {offsets = [0, 80], sizes = [8, 8], strides = [1, 1]} : vector<8x96xf32> to vector<8x8xf32>
    %33 = vector.extract_strided_slice %11 {offsets = [0, 88], sizes = [8, 8], strides = [1, 1]} : vector<8x96xf32> to vector<8x8xf32>
    %34 = vector.shape_cast %30 : vector<8x8xf32> to vector<1x8x8xf32>
    %35 = vector.shape_cast %31 : vector<8x8xf32> to vector<1x8x8xf32>
    %36 = vector.shape_cast %32 : vector<8x8xf32> to vector<1x8x8xf32>
    %37 = vector.shape_cast %33 : vector<8x8xf32> to vector<1x8x8xf32>
    %38 = tpu.concatenate %34, %35, %36, %37 in 0 : vector<1x8x8xf32>, vector<1x8x8xf32>, vector<1x8x8xf32>, vector<1x8x8xf32> -> vector<4x8x8xf32>
    %39 = arith.truncf %20 : vector<4x8x8xf32> to vector<4x8x8xbf16>
    %40 = arith.truncf %29 : vector<4x8x8xf32> to vector<4x8x8xbf16>
    %cst_8 = arith.constant dense<0.000000e+00> : vector<4x8x8xf32>
    %41 = tpu.matmul %39, %40, %cst_8 {dimension_numbers = #tpu.dot_dimension_numbers<[2], [2], [1], [1], [0, 0, 0, 1, 1, 1], [0], [0]>} : vector<4x8x8xbf16>, vector<4x8x8xbf16>, vector<4x8x8xf32> -> vector<4x8x8xf32>
    %c0_9 = arith.constant 0 : index
    %c0_10 = arith.constant 0 : index
    %c0_11 = arith.constant 0 : index
    %42 = vector.load %arg3[%c0_9, %c0_10, %c0_11] : memref<1x1x8xf32, #tpu.memory_space<vmem>>, vector<1x1x8xf32>
    %43 = vector.broadcast %42 : vector<1x1x8xf32> to vector<4x8x8xf32>
    %44 = arith.addf %41, %43 : vector<4x8x8xf32>
    %cst_12 = arith.constant dense<0xFF800000> : vector<4x8xf32>
    %45 = vector.multi_reduction <maximumf>, %44, %cst_12 [2] : vector<4x8x8xf32> to vector<4x8xf32>
    %46 = vector.shape_cast %45 : vector<4x8xf32> to vector<4x8x1xf32>
    %47 = vector.broadcast %46 : vector<4x8x1xf32> to vector<4x8x8xf32>
    %48 = arith.subf %44, %47 : vector<4x8x8xf32>
    %49 = math.exp %48 : vector<4x8x8xf32>
    %cst_13 = arith.constant dense<0.000000e+00> : vector<4x8xf32>
    %50 = vector.multi_reduction <add>, %49, %cst_13 [2] : vector<4x8x8xf32> to vector<4x8xf32>
    %51 = vector.shape_cast %50 : vector<4x8xf32> to vector<4x8x1xf32>
    %52 = vector.broadcast %51 : vector<4x8x1xf32> to vector<4x8x8xf32>
    %53 = arith.divf %49, %52 : vector<4x8x8xf32>
    %54 = arith.truncf %53 : vector<4x8x8xf32> to vector<4x8x8xbf16>
    %55 = arith.truncf %38 : vector<4x8x8xf32> to vector<4x8x8xbf16>
    %cst_14 = arith.constant dense<0.000000e+00> : vector<4x8x8xf32>
    %56 = tpu.matmul %54, %55, %cst_14 {dimension_numbers = #tpu.dot_dimension_numbers<[2], [1], [1], [2], [0, 0, 0, 1, 1, 2], [0], [0]>} : vector<4x8x8xbf16>, vector<4x8x8xbf16>, vector<4x8x8xf32> -> vector<4x8x8xf32>
    %57 = vector.extract_strided_slice %56 {offsets = [0, 0, 0], sizes = [1, 8, 8], strides = [1, 1, 1]} : vector<4x8x8xf32> to vector<1x8x8xf32>
    %58 = vector.shape_cast %57 : vector<1x8x8xf32> to vector<8x8xf32>
    %59 = vector.extract_strided_slice %56 {offsets = [1, 0, 0], sizes = [1, 8, 8], strides = [1, 1, 1]} : vector<4x8x8xf32> to vector<1x8x8xf32>
    %60 = vector.shape_cast %59 : vector<1x8x8xf32> to vector<8x8xf32>
    %61 = vector.extract_strided_slice %56 {offsets = [2, 0, 0], sizes = [1, 8, 8], strides = [1, 1, 1]} : vector<4x8x8xf32> to vector<1x8x8xf32>
    %62 = vector.shape_cast %61 : vector<1x8x8xf32> to vector<8x8xf32>
    %63 = vector.extract_strided_slice %56 {offsets = [3, 0, 0], sizes = [1, 8, 8], strides = [1, 1, 1]} : vector<4x8x8xf32> to vector<1x8x8xf32>
    %64 = vector.shape_cast %63 : vector<1x8x8xf32> to vector<8x8xf32>
    %65 = tpu.concatenate %58, %60, %62, %64 in 1 : vector<8x8xf32>, vector<8x8xf32>, vector<8x8xf32>, vector<8x8xf32> -> vector<8x32xf32>
    %c0_15 = arith.constant 0 : index
    %c0_16 = arith.constant 0 : index
    %c0_17 = arith.constant 0 : index
    %66 = vector.load %arg9[%c0_15, %c0_16, %c0_17] : memref<1x32x32xbf16, #tpu.memory_space<vmem>>, vector<1x32x32xbf16>
    %67 = vector.shape_cast %66 : vector<1x32x32xbf16> to vector<32x32xbf16>
    %68 = arith.truncf %65 : vector<8x32xf32> to vector<8x32xbf16>
    %cst_18 = arith.constant dense<0.000000e+00> : vector<8x32xf32>
    %69 = tpu.matmul %68, %67, %cst_18 {dimension_numbers = #tpu.dot_dimension_numbers<[1], [0], [0], [1], [0, 0, 1, 1], [], []>} : vector<8x32xbf16>, vector<32x32xbf16>, vector<8x32xf32> -> vector<8x32xf32>
    %c0_19 = arith.constant 0 : index
    %c0_20 = arith.constant 0 : index
    %c0_21 = arith.constant 0 : index
    %70 = vector.load %arg10[%c0_19, %c0_20, %c0_21] : memref<1x1x32xf32, #tpu.memory_space<vmem>>, vector<1x1x32xf32>
    %71 = vector.shape_cast %70 : vector<1x1x32xf32> to vector<1x32xf32>
    %72 = vector.broadcast %71 : vector<1x32xf32> to vector<8x32xf32>
    %73 = arith.addf %69, %72 : vector<8x32xf32>
    %74 = arith.addf %73, %3 : vector<8x32xf32>
    %c0_22 = arith.constant 0 : index
    %c0_23 = arith.constant 0 : index
    %c0_24 = arith.constant 0 : index
    %75 = vector.load %arg11[%c0_22, %c0_23, %c0_24] : memref<1x1x32xf32, #tpu.memory_space<vmem>>, vector<1x1x32xf32>
    %76 = vector.shape_cast %75 : vector<1x1x32xf32> to vector<1x32xf32>
    %c0_25 = arith.constant 0 : index
    %c0_26 = arith.constant 0 : index
    %c0_27 = arith.constant 0 : index
    %77 = vector.load %arg12[%c0_25, %c0_26, %c0_27] : memref<1x1x32xf32, #tpu.memory_space<vmem>>, vector<1x1x32xf32>
    %78 = vector.shape_cast %77 : vector<1x1x32xf32> to vector<1x32xf32>
    %cst_28 = arith.constant dense<0.000000e+00> : vector<8xf32>
    %79 = vector.multi_reduction <add>, %74, %cst_28 [1] : vector<8x32xf32> to vector<8xf32>
    %80 = vector.shape_cast %79 : vector<8xf32> to vector<8x1xf32>
    %cst_29 = arith.constant 3.200000e+01 : f32
    %81 = vector.broadcast %cst_29 : f32 to vector<8x1xf32>
    %82 = arith.divf %80, %81 : vector<8x1xf32>
    %83 = vector.broadcast %82 : vector<8x1xf32> to vector<8x32xf32>
    %84 = arith.subf %74, %83 : vector<8x32xf32>
    %85 = arith.mulf %84, %84 : vector<8x32xf32>
    %cst_30 = arith.constant dense<0.000000e+00> : vector<8xf32>
    %86 = vector.multi_reduction <add>, %85, %cst_30 [1] : vector<8x32xf32> to vector<8xf32>
    %87 = vector.shape_cast %86 : vector<8xf32> to vector<8x1xf32>
    %cst_31 = arith.constant 3.200000e+01 : f32
    %88 = vector.broadcast %cst_31 : f32 to vector<8x1xf32>
    %89 = arith.divf %87, %88 : vector<8x1xf32>
    %90 = vector.broadcast %82 : vector<8x1xf32> to vector<8x32xf32>
    %91 = arith.subf %74, %90 : vector<8x32xf32>
    %cst_32 = arith.constant 9.99999996E-13 : f32
    %92 = vector.broadcast %cst_32 : f32 to vector<8x1xf32>
    %93 = arith.addf %89, %92 : vector<8x1xf32>
    %94 = math.rsqrt %93 : vector<8x1xf32>
    %95 = vector.broadcast %94 : vector<8x1xf32> to vector<8x32xf32>
    %96 = arith.mulf %91, %95 : vector<8x32xf32>
    %97 = vector.broadcast %76 : vector<1x32xf32> to vector<8x32xf32>
    %98 = arith.mulf %96, %97 : vector<8x32xf32>
    %99 = vector.broadcast %78 : vector<1x32xf32> to vector<8x32xf32>
    %100 = arith.addf %98, %99 : vector<8x32xf32>
    %c0_33 = arith.constant 0 : index
    %c0_34 = arith.constant 0 : index
    %c0_35 = arith.constant 0 : index
    %101 = vector.load %arg13[%c0_33, %c0_34, %c0_35] : memref<1x32x64xbf16, #tpu.memory_space<vmem>>, vector<1x32x64xbf16>
    %102 = vector.shape_cast %101 : vector<1x32x64xbf16> to vector<32x64xbf16>
    %103 = arith.truncf %100 : vector<8x32xf32> to vector<8x32xbf16>
    %cst_36 = arith.constant dense<0.000000e+00> : vector<8x64xf32>
    %104 = tpu.matmul %103, %102, %cst_36 {dimension_numbers = #tpu.dot_dimension_numbers<[1], [0], [0], [1], [0, 0, 1, 1], [], []>} : vector<8x32xbf16>, vector<32x64xbf16>, vector<8x64xf32> -> vector<8x64xf32>
    %c0_37 = arith.constant 0 : index
    %c0_38 = arith.constant 0 : index
    %c0_39 = arith.constant 0 : index
    %105 = vector.load %arg14[%c0_37, %c0_38, %c0_39] : memref<1x1x64xf32, #tpu.memory_space<vmem>>, vector<1x1x64xf32>
    %106 = vector.shape_cast %105 : vector<1x1x64xf32> to vector<1x64xf32>
    %107 = vector.broadcast %106 : vector<1x64xf32> to vector<8x64xf32>
    %108 = arith.addf %104, %107 : vector<8x64xf32>
    %cst_40 = arith.constant 5.000000e-01 : f32
    %109 = vector.broadcast %cst_40 : f32 to vector<8x64xf32>
    %110 = arith.mulf %109, %108 : vector<8x64xf32>
    %cst_41 = arith.constant 0.707106769 : f32
    %111 = vector.broadcast %cst_41 : f32 to vector<8x64xf32>
    %112 = arith.mulf %108, %111 : vector<8x64xf32>
    %cst_42 = arith.constant 0.000000e+00 : f32
    %113 = vector.broadcast %cst_42 : f32 to vector<8x64xf32>
    %114 = arith.cmpf oge, %112, %113 : vector<8x64xf32>
    %cst_43 = arith.constant 1.000000e+00 : f32
    %cst_44 = arith.constant -1.000000e+00 : f32
    %115 = vector.broadcast %cst_43 : f32 to vector<8x64xf32>
    %116 = vector.broadcast %cst_44 : f32 to vector<8x64xf32>
    %117 = arith.select %114, %115, %116 : vector<8x64xi1>, vector<8x64xf32>
    %118 = math.absf %112 : vector<8x64xf32>
    %cst_45 = arith.constant 0.327591091 : f32
    %119 = vector.broadcast %cst_45 : f32 to vector<8x64xf32>
    %120 = arith.mulf %119, %118 : vector<8x64xf32>
    %cst_46 = arith.constant 1.000000e+00 : f32
    %121 = vector.broadcast %cst_46 : f32 to vector<8x64xf32>
    %122 = arith.addf %121, %120 : vector<8x64xf32>
    %cst_47 = arith.constant 1.000000e+00 : f32
    %123 = vector.broadcast %cst_47 : f32 to vector<8x64xf32>
    %124 = arith.divf %123, %122 : vector<8x64xf32>
    %cst_48 = arith.constant 1.06140542 : f32
    %125 = vector.broadcast %cst_48 : f32 to vector<8x64xf32>
    %126 = arith.mulf %125, %124 : vector<8x64xf32>
    %cst_49 = arith.constant -1.45315206 : f32
    %127 = vector.broadcast %cst_49 : f32 to vector<8x64xf32>
    %128 = arith.addf %126, %127 : vector<8x64xf32>
    %129 = arith.mulf %128, %124 : vector<8x64xf32>
    %cst_50 = arith.constant 1.42141378 : f32
    %130 = vector.broadcast %cst_50 : f32 to vector<8x64xf32>
    %131 = arith.addf %129, %130 : vector<8x64xf32>
    %132 = arith.mulf %131, %124 : vector<8x64xf32>
    %cst_51 = arith.constant -0.284496725 : f32
    %133 = vector.broadcast %cst_51 : f32 to vector<8x64xf32>
    %134 = arith.addf %132, %133 : vector<8x64xf32>
    %135 = arith.mulf %134, %124 : vector<8x64xf32>
    %cst_52 = arith.constant 0.254829586 : f32
    %136 = vector.broadcast %cst_52 : f32 to vector<8x64xf32>
    %137 = arith.addf %135, %136 : vector<8x64xf32>
    %138 = arith.mulf %137, %124 : vector<8x64xf32>
    %cst_53 = arith.constant 0.000000e+00 : f32
    %139 = vector.broadcast %cst_53 : f32 to vector<8x64xf32>
    %140 = arith.subf %139, %118 : vector<8x64xf32>
    %141 = arith.mulf %140, %118 : vector<8x64xf32>
    %142 = math.exp %141 : vector<8x64xf32>
    %143 = arith.mulf %138, %142 : vector<8x64xf32>
    %cst_54 = arith.constant 1.000000e+00 : f32
    %144 = vector.broadcast %cst_54 : f32 to vector<8x64xf32>
    %145 = arith.subf %144, %143 : vector<8x64xf32>
    %146 = arith.mulf %117, %145 : vector<8x64xf32>
    %cst_55 = arith.constant 1.000000e+00 : f32
    %147 = vector.broadcast %cst_55 : f32 to vector<8x64xf32>
    %148 = arith.addf %147, %146 : vector<8x64xf32>
    %149 = arith.mulf %110, %148 : vector<8x64xf32>
    %c0_56 = arith.constant 0 : index
    %c0_57 = arith.constant 0 : index
    %c0_58 = arith.constant 0 : index
    %150 = vector.load %arg15[%c0_56, %c0_57, %c0_58] : memref<1x64x32xbf16, #tpu.memory_space<vmem>>, vector<1x64x32xbf16>
    %151 = vector.shape_cast %150 : vector<1x64x32xbf16> to vector<64x32xbf16>
    %152 = arith.truncf %149 : vector<8x64xf32> to vector<8x64xbf16>
    %cst_59 = arith.constant dense<0.000000e+00> : vector<8x32xf32>
    %153 = tpu.matmul %152, %151, %cst_59 {dimension_numbers = #tpu.dot_dimension_numbers<[1], [0], [0], [1], [0, 0, 1, 1], [], []>} : vector<8x64xbf16>, vector<64x32xbf16>, vector<8x32xf32> -> vector<8x32xf32>
    %c0_60 = arith.constant 0 : index
    %c0_61 = arith.constant 0 : index
    %c0_62 = arith.constant 0 : index
    %154 = vector.load %arg16[%c0_60, %c0_61, %c0_62] : memref<1x1x32xf32, #tpu.memory_space<vmem>>, vector<1x1x32xf32>
    %155 = vector.shape_cast %154 : vector<1x1x32xf32> to vector<1x32xf32>
    %156 = vector.broadcast %155 : vector<1x32xf32> to vector<8x32xf32>
    %157 = arith.addf %153, %156 : vector<8x32xf32>
    %158 = arith.addf %157, %100 : vector<8x32xf32>
    %c0_63 = arith.constant 0 : index
    %c0_64 = arith.constant 0 : index
    %c0_65 = arith.constant 0 : index
    %159 = vector.load %arg17[%c0_63, %c0_64, %c0_65] : memref<1x1x32xf32, #tpu.memory_space<vmem>>, vector<1x1x32xf32>
    %160 = vector.shape_cast %159 : vector<1x1x32xf32> to vector<1x32xf32>
    %c0_66 = arith.constant 0 : index
    %c0_67 = arith.constant 0 : index
    %c0_68 = arith.constant 0 : index
    %161 = vector.load %arg18[%c0_66, %c0_67, %c0_68] : memref<1x1x32xf32, #tpu.memory_space<vmem>>, vector<1x1x32xf32>
    %162 = vector.shape_cast %161 : vector<1x1x32xf32> to vector<1x32xf32>
    %cst_69 = arith.constant dense<0.000000e+00> : vector<8xf32>
    %163 = vector.multi_reduction <add>, %158, %cst_69 [1] : vector<8x32xf32> to vector<8xf32>
    %164 = vector.shape_cast %163 : vector<8xf32> to vector<8x1xf32>
    %cst_70 = arith.constant 3.200000e+01 : f32
    %165 = vector.broadcast %cst_70 : f32 to vector<8x1xf32>
    %166 = arith.divf %164, %165 : vector<8x1xf32>
    %167 = vector.broadcast %166 : vector<8x1xf32> to vector<8x32xf32>
    %168 = arith.subf %158, %167 : vector<8x32xf32>
    %169 = arith.mulf %168, %168 : vector<8x32xf32>
    %cst_71 = arith.constant dense<0.000000e+00> : vector<8xf32>
    %170 = vector.multi_reduction <add>, %169, %cst_71 [1] : vector<8x32xf32> to vector<8xf32>
    %171 = vector.shape_cast %170 : vector<8xf32> to vector<8x1xf32>
    %cst_72 = arith.constant 3.200000e+01 : f32
    %172 = vector.broadcast %cst_72 : f32 to vector<8x1xf32>
    %173 = arith.divf %171, %172 : vector<8x1xf32>
    %174 = vector.broadcast %166 : vector<8x1xf32> to vector<8x32xf32>
    %175 = arith.subf %158, %174 : vector<8x32xf32>
    %cst_73 = arith.constant 9.99999996E-13 : f32
    %176 = vector.broadcast %cst_73 : f32 to vector<8x1xf32>
    %177 = arith.addf %173, %176 : vector<8x1xf32>
    %178 = math.rsqrt %177 : vector<8x1xf32>
    %179 = vector.broadcast %178 : vector<8x1xf32> to vector<8x32xf32>
    %180 = arith.mulf %175, %179 : vector<8x32xf32>
    %181 = vector.broadcast %160 : vector<1x32xf32> to vector<8x32xf32>
    %182 = arith.mulf %180, %181 : vector<8x32xf32>
    %183 = vector.broadcast %162 : vector<1x32xf32> to vector<8x32xf32>
    %184 = arith.addf %182, %183 : vector<8x32xf32>
    %c0_74 = arith.constant 0 : index
    %c0_75 = arith.constant 0 : index
    %185 = vector.load %arg23[%c0_74, %c0_75] : memref<8x32xf32, #tpu.memory_space<vmem>>, vector<8x32xf32>
    tpu.vector_store %arg23[%c0_74, %c0_75], %184 {strides = array<i32>} : memref<8x32xf32, #tpu.memory_space<vmem>>, vector<8x32xf32>,
    %c1_i32 = arith.constant 1 : i32
    %186 = arith.cmpi eq, %arg1, %c1_i32 : i32
    %187 = arith.extui %186 : i1 to i32
    %c0_i32_76 = arith.constant 0 : i32
    %188 = arith.cmpi ne, %187, %c0_i32_76 : i32
    scf.if %188 {
      %c0_77 = arith.constant 0 : index
      %c0_78 = arith.constant 0 : index
      %189 = vector.load %arg19[%c0_77, %c0_78] : memref<32x128xbf16, #tpu.memory_space<vmem>>, vector<32x128xbf16>
      %190 = arith.truncf %184 : vector<8x32xf32> to vector<8x32xbf16>
      %cst_79 = arith.constant dense<0.000000e+00> : vector<8x128xf32>
      %191 = tpu.matmul %190, %189, %cst_79 {dimension_numbers = #tpu.dot_dimension_numbers<[1], [0], [0], [1], [0, 0, 1, 1], [], []>} : vector<8x32xbf16>, vector<32x128xbf16>, vector<8x128xf32> -> vector<8x128xf32>
      %c0_80 = arith.constant 0 : index
      %c0_81 = arith.constant 0 : index
      %192 = vector.load %arg20[%c0_80, %c0_81] : memref<1x128xf32, #tpu.memory_space<vmem>>, vector<1x128xf32>
      %193 = vector.broadcast %192 : vector<1x128xf32> to vector<8x128xf32>
      %194 = arith.addf %191, %193 : vector<8x128xf32>
      %c0_82 = arith.constant 0 : index
      %c0_83 = arith.constant 0 : index
      %c0_84 = arith.constant 0 : index
      %195 = vector.load %arg21[%c0_82, %c0_83, %c0_84] : memref<1x8x128xf32, #tpu.memory_space<vmem>>, vector<1x8x128xf32>
      %196 = vector.shape_cast %195 : vector<1x8x128xf32> to vector<8x128xf32>
      %197 = vector.shape_cast %194 : vector<8x128xf32> to vector<1x8x128xf32>
      tpu.vector_store %arg21[%c0_82, %c0_83, %c0_84], %197 {strides = array<i32>} : memref<1x8x128xf32, #tpu.memory_space<vmem>>, vector<1x8x128xf32>,
      %cst_85 = arith.constant dense<0xFF800000> : vector<8xf32>
      %198 = vector.multi_reduction <maximumf>, %194, %cst_85 [1] : vector<8x128xf32> to vector<8xf32>
      %199 = vector.shape_cast %198 : vector<8xf32> to vector<8x1xf32>
      %200 = vector.broadcast %199 : vector<8x1xf32> to vector<8x128xf32>
      %201 = arith.subf %194, %200 : vector<8x128xf32>
      %202 = math.exp %201 : vector<8x128xf32>
      %cst_86 = arith.constant dense<0.000000e+00> : vector<8xf32>
      %203 = vector.multi_reduction <add>, %202, %cst_86 [1] : vector<8x128xf32> to vector<8xf32>
      %204 = vector.shape_cast %203 : vector<8xf32> to vector<8x1xf32>
      %205 = math.log %204 : vector<8x1xf32>
      %206 = arith.addf %205, %199 : vector<8x1xf32>
      %207 = tpu.iota {dimensions = array<i32: 1>} : vector<8x128xi32>
      %c0_87 = arith.constant 0 : index
      %c0_88 = arith.constant 0 : index
      %c0_89 = arith.constant 0 : index
      %208 = vector.load %arg4[%c0_87, %c0_88, %c0_89] : memref<1x8x1xi32, #tpu.memory_space<vmem>>, vector<1x8x1xi32>
      %209 = vector.shape_cast %208 : vector<1x8x1xi32> to vector<8x1xi32>
      %210 = vector.broadcast %209 : vector<8x1xi32> to vector<8x128xi32>
      %211 = arith.cmpi eq, %207, %210 : vector<8x128xi32>
      %212 = arith.extui %211 : vector<8x128xi1> to vector<8x128xi32>
      %213 = arith.sitofp %212 : vector<8x128xi32> to vector<8x128xf32>
      %214 = vector.broadcast %206 : vector<8x1xf32> to vector<8x128xf32>
      %215 = arith.subf %214, %194 : vector<8x128xf32>
      %216 = arith.mulf %213, %215 : vector<8x128xf32>
      %cst_90 = arith.constant dense<0.000000e+00> : vector<8xf32>
      %217 = vector.multi_reduction <add>, %216, %cst_90 [1] : vector<8x128xf32> to vector<8xf32>
      %218 = vector.shape_cast %217 : vector<8xf32> to vector<8x1xf32>
      %c0_91 = arith.constant 0 : index
      %c0_92 = arith.constant 0 : index
      %c0_93 = arith.constant 0 : index
      %219 = vector.load %arg22[%c0_91, %c0_92, %c0_93] : memref<1x8x1xf32, #tpu.memory_space<vmem>>, vector<1x8x1xf32>
      %220 = vector.shape_cast %219 : vector<1x8x1xf32> to vector<8x1xf32>
      %221 = vector.shape_cast %218 : vector<8x1xf32> to vector<1x8x1xf32>
      tpu.vector_store %arg22[%c0_91, %c0_92, %c0_93], %221 {strides = array<i32>} : memref<1x8x1xf32, #tpu.memory_space<vmem>>, vector<1x8x1xf32>,
    } else {
    }
    return
  }
  func.func @transform_0(%arg0: i32, %arg1: i32) -> (i32, i32, i32) {
    %c0_i32 = arith.constant 0 : i32
    %c0_i32_0 = arith.constant 0 : i32
    %c0_i32_1 = arith.constant 0 : i32
    return %arg0, %c0_i32, %c0_i32_0 : i32, i32, i32
  }
  func.func @transform_1(%arg0: i32, %arg1: i32) -> (i32, i32, i32) {
    %c0_i32 = arith.constant 0 : i32
    %c0_i32_0 = arith.constant 0 : i32
    %c0_i32_1 = arith.constant 0 : i32
    return %arg0, %c0_i32, %c0_i32_0 : i32, i32, i32
  }
  func.func @transform_2(%arg0: i32, %arg1: i32) -> (i32, i32, i32) {
    %c0_i32 = arith.constant 0 : i32
    %c0_i32_0 = arith.constant 0 : i32
    %c0_i32_1 = arith.constant 0 : i32
    return %arg0, %c0_i32, %c0_i32_0 : i32, i32, i32
  }
  func.func @transform_3(%arg0: i32, %arg1: i32) -> (i32, i32) {
    %c0_i32 = arith.constant 0 : i32
    %c0_i32_0 = arith.constant 0 : i32
    %c0_i32_1 = arith.constant 0 : i32
    return %c0_i32, %c0_i32_0 : i32, i32
  }
  func.func @transform_4(%arg0: i32, %arg1: i32) -> (i32, i32) {
    %c0_i32 = arith.constant 0 : i32
    %c0_i32_0 = arith.constant 0 : i32
    %c0_i32_1 = arith.constant 0 : i32
    return %c0_i32, %c0_i32_0 : i32, i32
  }
  func.func @transform_5(%arg0: i32, %arg1: i32) -> (i32, i32, i32) {
    %c0_i32 = arith.constant 0 : i32
    %c0_i32_0 = arith.constant 0 : i32
    %c0_i32_1 = arith.constant 0 : i32
    return %arg1, %c0_i32, %c0_i32_0 : i32, i32, i32
  }
  func.func @transform_6(%arg0: i32, %arg1: i32) -> (i32, i32, i32) {
    %c0_i32 = arith.constant 0 : i32
    %c0_i32_0 = arith.constant 0 : i32
    %c0_i32_1 = arith.constant 0 : i32
    return %arg1, %c0_i32, %c0_i32_0 : i32, i32, i32
  }
  func.func @transform_7(%arg0: i32, %arg1: i32) -> (i32, i32, i32) {
    %c0_i32 = arith.constant 0 : i32
    %c0_i32_0 = arith.constant 0 : i32
    %c0_i32_1 = arith.constant 0 : i32
    return %arg1, %c0_i32, %c0_i32_0 : i32, i32, i32
  }
  func.func @transform_8(%arg0: i32, %arg1: i32) -> (i32, i32, i32) {
    %c0_i32 = arith.constant 0 : i32
    %c0_i32_0 = arith.constant 0 : i32
    %c0_i32_1 = arith.constant 0 : i32
    return %arg1, %c0_i32, %c0_i32_0 : i32, i32, i32
  }
  func.func @transform_9(%arg0: i32, %arg1: i32) -> (i32, i32, i32) {
    %c0_i32 = arith.constant 0 : i32
    %c0_i32_0 = arith.constant 0 : i32
    %c0_i32_1 = arith.constant 0 : i32
    return %arg1, %c0_i32, %c0_i32_0 : i32, i32, i32
  }
  func.func @transform_10(%arg0: i32, %arg1: i32) -> (i32, i32, i32) {
    %c0_i32 = arith.constant 0 : i32
    %c0_i32_0 = arith.constant 0 : i32
    %c0_i32_1 = arith.constant 0 : i32
    return %arg1, %c0_i32, %c0_i32_0 : i32, i32, i32
  }
  func.func @transform_11(%arg0: i32, %arg1: i32) -> (i32, i32, i32) {
    %c0_i32 = arith.constant 0 : i32
    %c0_i32_0 = arith.constant 0 : i32
    %c0_i32_1 = arith.constant 0 : i32
    return %arg1, %c0_i32, %c0_i32_0 : i32, i32, i32
  }
  func.func @transform_12(%arg0: i32, %arg1: i32) -> (i32, i32, i32) {
    %c0_i32 = arith.constant 0 : i32
    %c0_i32_0 = arith.constant 0 : i32
    %c0_i32_1 = arith.constant 0 : i32
    return %arg1, %c0_i32, %c0_i32_0 : i32, i32, i32
  }
  func.func @transform_13(%arg0: i32, %arg1: i32) -> (i32, i32, i32) {
    %c0_i32 = arith.constant 0 : i32
    %c0_i32_0 = arith.constant 0 : i32
    %c0_i32_1 = arith.constant 0 : i32
    return %arg1, %c0_i32, %c0_i32_0 : i32, i32, i32
  }
  func.func @transform_14(%arg0: i32, %arg1: i32) -> (i32, i32, i32) {
    %c0_i32 = arith.constant 0 : i32
    %c0_i32_0 = arith.constant 0 : i32
    %c0_i32_1 = arith.constant 0 : i32
    return %arg1, %c0_i32, %c0_i32_0 : i32, i32, i32
  }
  func.func @transform_15(%arg0: i32, %arg1: i32) -> (i32, i32, i32) {
    %c0_i32 = arith.constant 0 : i32
    %c0_i32_0 = arith.constant 0 : i32
    %c0_i32_1 = arith.constant 0 : i32
    return %arg1, %c0_i32, %c0_i32_0 : i32, i32, i32
  }
  func.func @transform_16(%arg0: i32, %arg1: i32) -> (i32, i32, i32) {
    %c0_i32 = arith.constant 0 : i32
    %c0_i32_0 = arith.constant 0 : i32
    %c0_i32_1 = arith.constant 0 : i32
    return %arg1, %c0_i32, %c0_i32_0 : i32, i32, i32
  }
  func.func @transform_17(%arg0: i32, %arg1: i32) -> (i32, i32) {
    %c0_i32 = arith.constant 0 : i32
    %c0_i32_0 = arith.constant 0 : i32
    %c0_i32_1 = arith.constant 0 : i32
    return %c0_i32, %c0_i32_0 : i32, i32
  }
  func.func @transform_18(%arg0: i32, %arg1: i32) -> (i32, i32) {
    %c0_i32 = arith.constant 0 : i32
    %c0_i32_0 = arith.constant 0 : i32
    %c0_i32_1 = arith.constant 0 : i32
    return %c0_i32, %c0_i32_0 : i32, i32
  }
  func.func @transform_19(%arg0: i32, %arg1: i32) -> (i32, i32, i32) {
    %c0_i32 = arith.constant 0 : i32
    %c0_i32_0 = arith.constant 0 : i32
    %c0_i32_1 = arith.constant 0 : i32
    return %arg0, %c0_i32, %c0_i32_0 : i32, i32, i32
  }
  func.func @transform_20(%arg0: i32, %arg1: i32) -> (i32, i32, i32) {
    %c0_i32 = arith.constant 0 : i32
    %c0_i32_0 = arith.constant 0 : i32
    %c0_i32_1 = arith.constant 0 : i32
    return %arg0, %c0_i32, %c0_i32_0 : i32, i32, i32
  }
}

</mosaic_0001>

<bundles_post_ra>
// kernel: bert_token_classification_forward.1
= control target key start
LH: loop header
LB: loop body
LE: loop exit
PB: predicated region body
PF: predicated region fallthrough
CT: control target
= control target key end

     0   :  { %s4988_s0 = inlined_call_operand.hbm [shape: f32[2,8,32], index: 0, kind: input, shape index: {}]   ;;  %s4989_s1 = inlined_call_operand.hbm [shape: f32[2,1,8], index: 1, kind: input, shape index: {}]   ;;  %s4990_s2 = inlined_call_operand.hbm [shape: s32[2,8,1], index: 2, kind: input, shape index: {}]   ;;  %s4991_s3 = inlined_call_operand.hbm [shape: f32[1,32], index: 3, kind: input, shape index: {}]   ;;  %s4992_s4 = inlined_call_operand.hbm [shape: f32[1,32], index: 4, kind: input, shape index: {}]   ;;  %s4993_s5 = inlined_call_operand.hbm [shape: bf16[2,32,96], index: 5, kind: input, shape index: {}]   ;;  %s4994_s6 = inlined_call_operand.hbm [shape: f32[2,1,96], index: 6, kind: input, shape index: {}]   ;;  %s4995_s7 = inlined_call_operand.hbm [shape: bf16[2,32,32], index: 7, kind: input, shape index: {}]   ;;  %s4996_s8 = inlined_call_operand.hbm [shape: f32[2,1,32], index: 8, kind: input, shape index: {}]   ;;  %s4997_s9 = inlined_call_operand.hbm [shape: f32[2,1,32], index: 9, kind: input, shape index: {}]   ;;  %s4998_s10 = inlined_call_operand.hbm [shape: f32[2,1,32], index: 10, kind: input, shape index: {}]   ;;  %s4999_s11 = inlined_call_operand.hbm [shape: bf16[2,32,64], index: 11, kind: input, shape index: {}]   ;;  %s5000_s12 = inlined_call_operand.hbm [shape: f32[2,1,64], index: 12, kind: input, shape index: {}]   ;;  %s5001_s13 = inlined_call_operand.hbm [shape: bf16[2,64,32], index: 13, kind: input, shape index: {}]   ;;  %s5002_s14 = inlined_call_operand.hbm [shape: f32[2,1,32], index: 14, kind: input, shape index: {}]   ;;  %s5003_s15 = inlined_call_operand.hbm [shape: f32[2,1,32], index: 15, kind: input, shape index: {}]   ;;  %s5004_s16 = inlined_call_operand.hbm [shape: f32[2,1,32], index: 16, kind: input, shape index: {}]   ;;  %s5005_s17 = inlined_call_operand.hbm [shape: bf16[32,128], index: 17, kind: input, shape index: {}]   ;;  %s5006_s18 = inlined_call_operand.hbm [shape: f32[1,128], index: 18, kind: input, shape index: {}]   ;;  %s5007_s19 = inlined_call_operand.hbm [shape: f32[2,8,128], index: 19, kind: output, shape index: {0}]   ;;  %s5008_s20 = inlined_call_operand.hbm [shape: f32[2,8,1], index: 20, kind: output, shape index: {1}]  }
   0x1   :  { %5073 = sst [smem:[#allocation63_spill]] %s4988_s0 }
   0x2   :  { %5074 = sst [smem:[#allocation64_spill]] %s4989_s1 }
   0x3   :  { %5075 = sst [smem:[#allocation65_spill]] %s4990_s2 }
   0x4   :  { %5076 = sst [smem:[#allocation66_spill]] %s4991_s3 }
   0x5   :  { %5077 = sst [smem:[#allocation67_spill]] %s4992_s4 }
   0x6   :  { %5078 = sst [smem:[#allocation68_spill]] %s4993_s5 }
   0x7   :  { %5079 = sst [smem:[#allocation69_spill]] %s4994_s6 }
   0x8   :  { %5080 = sst [smem:[#allocation70_spill]] %s4995_s7 }
   0x9   :  { %5081 = sst [smem:[#allocation71_spill]] %s4996_s8 }
   0xa   :  { %5082 = sst [smem:[#allocation72_spill]] %s4997_s9 }
   0xb   :  { %5083 = sst [smem:[#allocation73_spill]] %s4998_s10 }
   0xc   :  { %5084 = sst [smem:[#allocation74_spill]] %s4999_s11 }
   0xd   :  { %5085 = sst [smem:[#allocation75_spill]] %s5000_s12 }
   0xe   :  { %5086 = sst [smem:[#allocation76_spill]] %s5001_s13 }
   0xf   :  { %5087 = sst [smem:[#allocation77_spill]] %s5002_s14 }
  0x10   :  { %5088 = sst [smem:[#allocation78_spill]] %s5003_s15 }
  0x11   :  { %5089 = sst [smem:[#allocation79_spill]] %s5004_s16 }
  0x12   :  { %5090 = sst [smem:[#allocation80_spill]] %s5007_s19 }
  0x13   :  { %5091 = sst [smem:[#allocation81_spill]] %s5008_s20 }
  0x14   :  { %26 = vsyncpa [#allocation4], 0 }
  0x15   :  { %28 = vsyncpa [#allocation4 + $0x1], 0 }
  0x16   :  { %29 = vsyncpa [#allocation7], 0 }
  0x17   :  { %31 = vsyncpa [#allocation7 + $0x1], 0 }
  0x18   :  { %32 = vsyncpa [#allocation10], 0 }
  0x19   :  { %33 = vsyncpa [#allocation13], 0 }
  0x1a   :  { %35 = vsyncpa [#allocation13 + $0x1], 0 }
  0x1b   :  { %36 = vsyncpa [#allocation16], 0 }
  0x1c   :  { %38 = vsyncpa [#allocation16 + $0x1], 0 }
  0x1d   :  { %39 = vsyncpa [#allocation19], 0 }
  0x1e   :  { %41 = vsyncpa [#allocation19 + $0x1], 0 }
  0x1f   :  { %42 = vsyncpa [#allocation22], 0 }
  0x20   :  { %44 = vsyncpa [#allocation22 + $0x1], 0 }
  0x21   :  { %45 = vsyncpa [#allocation25], 0 }
  0x22   :  { %47 = vsyncpa [#allocation25 + $0x1], 0 }
  0x23   :  { %48 = vsyncpa [#allocation28], 0 }
  0x24   :  { %50 = vsyncpa [#allocation28 + $0x1], 0 }
  0x25   :  { %51 = vsyncpa [#allocation31], 0 }
  0x26   :  { %52 = vsyncpa [#allocation5], 0 }
  0x27   :  { %54 = vsyncpa [#allocation5 + $0x1], 0 }
  0x28   :  { %55 = vsyncpa [#allocation35], 0 }
  0x29   :  { %57 = vsyncpa [#allocation35 + $0x1], 0  ;;  %s3968_s1 = smov 0   ;;  %s3970_s22 = smov 0  }
  0x2a   :  { %s3972_s23 = smov 0   ;;  %s3974_s24 = smov 0  }
  0x2b   :  { %s3976_s2 = smov 0   ;;  %s3978_s25 = smov 0  }
  0x2c   :  { %s3980_s3 = smov 0   ;;  %s3982_s26 = smov 0  }
  0x2d   :  { %s3984_s27 = smov 0   ;;  %s3986_s28 = smov 0  }
  0x2e   :  { %s3988_s4 = smov 0  }
  0x2f LB: > { %5092 = sst [smem:[#allocation48_spill]] %s3786_s22  ;;  %s4024_s29 = sadd.s32 4294967295, %s3822_s4   ;;  %s3822_s4 = sphi %s3988_s4, %s63_s4   ;;  %s3818_s28 = sphi %s3986_s28, %s5206_s28   ;;  %s3814_s27 = sphi %s3984_s27, %s5205_s27   ;;  %s3810_s26 = sphi %s3982_s26, %s5204_s26   ;;  %s3806_s3 = sphi %s3980_s3, %s5203_s3   ;;  %s3802_s25 = sphi %s3978_s25, %s5202_s25   ;;  %s3798_s2 = sphi %s3976_s2, %s5201_s2   ;;  %s3794_s24 = sphi %s3974_s24, %s5200_s24   ;;  %s3790_s23 = sphi %s3972_s23, %s5199_s23   ;;  %s3786_s22 = sphi %s3970_s22, %s5198_s22   ;;  %s3782_s1 = sphi %s3968_s1, %s5192_s1  }
  0x30   : > { %5093 = sst [smem:[#allocation49_spill]] %s3794_s24  ;;  %s2647_s30 = sadd.s32 4294967294, %s3822_s4  }
  0x31   : > { %5094 = sst [smem:[#allocation50_spill]] %s3798_s2  ;;  %s72_s0 = sadd.s32 1, %s3814_s27 }
  0x32   : > { %5095 = sst [smem:[#allocation51_spill]] %s3806_s3  ;;  %s75_s21 = sadd.s32 1, %s3818_s28 }
  0x33   : > { %5096 = sst [smem:[#allocation52_spill]] %s3810_s26  ;;  %p73_p0 = scmp.ge.s32.totalorder %s72_s0, 2 }
  0x34   : > { %5097 = sst [smem:[#allocation53_spill]] %s4024_s29  ;;  %s82_s20 = sadd.s32 1, %s3802_s25 }
  0x35   : > { %p5024_p1 = scmp.ne.s32.totalorder %s3802_s25, %s3798_s2  ;;  %p90_p2 = scmp.eq.s32.totalorder %s3822_s4, 0 }
  0x36   : > { %s5208_s0 = smov (%p73_p0, %s72_s0), 0  ;;  %s5210_s21 = smov (!%p73_p0, %s75_s21), %s3818_s28 }
  0x37   : > { %5098 = sst [smem:[#allocation54_spill]] %s5208_s0  ;;  %p4041_p3 = por %p90_p2, %p5024_p1 }
  0x38   : > { %p5023_p4 = scmp.ne.s32.totalorder %s3798_s2, %s3794_s24  ;;  %p77_p5 = scmp.ge.s32.totalorder %s5210_s21, 2 }
  0x39   : > { %s5099_s19 = scalar_select %p4041_p3, 1, 0 }
  0x3a   : > { %p5039_p6 = scmp.eq.s32.totalorder %s4024_s29, 0  ;;  %s199_s26 = ssub.s32 %s3814_s27, %s5208_s0 }
  0x3b   : > { %s202_s3 = sadd.s32 1, %s3790_s23  ;;  %s5212_s21 = smov (%p77_p5, %s5210_s21), 0 }
  0x3c   : > { %5100 = sst [smem:[#allocation55_spill]] %s5212_s21  ;;  %p4058_p7 = por %p5039_p6, %p5023_p4 }
  0x3d   : > { %p200_p8 = scmp.eq.s32.totalorder %s199_s26, 0  ;;  %s79_s14 = ssub.s32 %s3818_s28, %s5212_s21 }
  0x3e   : > { %s5101_s16 = scalar_select %p4058_p7, 1, 0 }
  0x3f   : > { %p209_p9 = scmp.ne.s32.totalorder %s3790_s23, %s3786_s22  ;;  %p80_p10 = scmp.eq.s32.totalorder %s79_s14, 0 }
  0x40   : > { %5102 = sst [smem:[#allocation56_spill]] %s5101_s16  ;;  %p215_p11 = scmp.ne.s32.totalorder %s3786_s22, %s3782_s1 }
  0x41   : > { %s4069_s0 = scalar_select %p200_p8, %s3790_s23, %s202_s3  }
  0x42   : > { %s4072_s12 = scalar_select %p80_p10, %s3802_s25, %s82_s20  }
  0x43   : > { %5103 = sst [smem:[#allocation57_spill]] %s4069_s0  ;;  %p4076_p12 = por %p209_p9, %p90_p2 }
  0x44   : > { %5104 = sst [smem:[#allocation58_spill]] %s4072_s12  ;;  %p4082_p13 = por %p215_p11, %p5039_p6 }
  0x45   : > { %s5105_s10 = scalar_select %p4076_p12, 1, 0 }
  0x46   : > { %s5106_s8 = scalar_select %p4082_p13, 1, 0 }
  0x47   : > { %p567_p0 = scmp.eq.s32.totalorder %s4024_s29, 3  ;;  %p573_p5 = scmp.eq.s32.totalorder %s2647_s30, 3 }
  0x48   : > { %5107 = sst [smem:[#allocation59_spill]] %s5106_s8  ;;  %p2648_p4 = scmp.ge.s32.totalorder %s3822_s4, 1 }
  0x49   : > { %p606_p1 = scmp.lt.s32.totalorder %s3822_s4, 5  ;;  %p5108_p7 = scmp.ne.s32.totalorder %s3802_s25, %s3798_s2 }
  0x4a   : > { %p5111_p10 = scmp.ne.s32.totalorder %s3798_s2, %s3794_s24  ;;  %s3824_s3 = smov [#allocation9]  }
  0x4b   : > { %p4092_p8 = por %p567_p0, %p5108_p7  ;;  %p4103_p2 = pnand %p2648_p4, %p606_p1 }
  0x4c   : > { %p4099_p3 = por %p573_p5, %p5111_p10  ;;  %s619_s26 = sshll.u32 %s3824_s3, 4  ;;  %s620_s26 = int_to_ptr.vmem [resolvable:$true] %s619_s26 }
  0x4d   : > { %s5109_s14 = scalar_select %p4092_p8, 1, 0 }
  0x4e   : > { %s5112_s20 = scalar_select %p4099_p3, 1, 0 }
  0x4f   : > { %5110 = sst [smem:[#allocation60_spill]] %s5109_s14  ;;  %p2917_p9 = pneg %p4103_p2 }
  0x50   : > { %5113 = sst [smem:[#allocation61_spill]] %s5112_s20  ;;  %s3825_s30 = smov [#allocation30]  }
  0x51   : > { %s5114_s1 = scalar_select %p4103_p2, 1, 0 }
  0x52   : > { %s640_s21 = sshll.u32 %s3825_s30, 4  ;;  %p4111_p7 = pnand %p2917_p9, %p5039_p6  ;;  %s4115_s21 = int_to_ptr.vmem [resolvable:$true] %s640_s21 }
  0x53   : > { %5115 = sst [smem:[#allocation62_spill]] %s5114_s1  ;;  %s5117_s24 = sld [smem:[#allocation66_spill]] }
  0x54   : > { %p4125_p4 = pneg %p4111_p7 }
  0x59   : > { %s5118_s14 = smov %s5117_s24  ;;  %s3100_s8 = scalar_lea.hbm %s5117_s24, 16 }
  0x5a   : > { %p3101_p1 = scmp.ne.s32.totalorder %s5118_s14, %s3100_s8  ;;  %p3107_p5 = scmp.lt.u32.totalorder %s3100_s8, %s5118_s14 }
  0x5c   : > { %p3103_p11 = pnand %p4125_p4, %p3101_p1 }
  0x5e   : > { %p3104_p0 = pneg %p3103_p11 }
  0x60   : > { %p3109_p10 = pnand %p3107_p5, %p3104_p0 }
  0x62   : > { %3112 = shalt.err (!%p3109_p10)
}
  0x63   : > { %s3113_s24 = scalar_lea.vmem %s620_s26, 16  ;;  %s3120_s16 = scalar_lea.vmem %s620_s26, 32 }
  0x64   : > { %p3114_p9 = scmp.ne.s32.totalorder %s620_s26, %s3113_s24  ;;  %p3121_p8 = scmp.lt.s32.totalorder %s620_s26, %s620_s26 }
  0x65   : > { %p3122_p13 = scmp.lt.s32.totalorder %s3120_s16, %s3113_s24 }
  0x66   : > { %p3116_p6 = pnand %p3114_p9, %p4125_p4 }
  0x67   : > { %p3123_p2 = por %p3122_p13, %p3121_p8 }
  0x68   : > { %p3117_p3 = pneg %p3116_p6 }
  0x6a   : > { %p3124_p12 = pnand %p3123_p2, %p3117_p3 }
  0x6c   : > { %3127 = shalt.err (!%p3124_p12)
}
  0x6d   : > { %2920 = dma.hbm_to_vmem [thread:$0]  (!%p4111_p7), %s5118_s14, 16, %s620_s26, [#allocation10]  }
  0x6e   : > { %s3128_s20 = scalar_lea.hbm %s5005_s17, 256 }
  0x6f   : > { %p3129_p6 = scmp.ne.s32.totalorder %s5005_s17, %s3128_s20  ;;  %p3135_p3 = scmp.lt.u32.totalorder %s3128_s20, %s5005_s17 }
  0x71   : > { %p3131_p1 = pnand %p3129_p6, %p4125_p4 }
  0x73   : > { %p3132_p13 = pneg %p3131_p1 }
  0x75   : > { %p3137_p12 = pnand %p3135_p3, %p3132_p13 }
  0x77   : > { %3140 = shalt.err (!%p3137_p12)
}
  0x78   : > { %s3141_s26 = scalar_lea.vmem %s4115_s21, 256  ;;  %p3149_p0 = scmp.lt.s32.totalorder %s4115_s21, %s4115_s21 }
  0x79   : > { %p3142_p8 = scmp.ne.s32.totalorder %s4115_s21, %s3141_s26  ;;  %p3150_p5 = scmp.lt.s32.totalorder %s3141_s26, %s3141_s26 }
  0x7b   : > { %p3144_p2 = pnand %p3142_p8, %p4125_p4  ;;  %p3151_p10 = por %p3150_p5, %p3149_p0 }
  0x7d   : > { %p3145_p11 = pneg %p3144_p2 }
  0x7f   : > { %p3152_p9 = pnand %p3151_p10, %p3145_p11 }
  0x81   : > { %3155 = shalt.err (!%p3152_p9)
}
  0x82   : > { %s3826_s2 = smov 64   ;;  %s3827_s22 = smov 4  }
  0x83   : > { %2926 = dma.hbm_to_vmem [thread:$0]  (!%p4111_p7), %s5005_s17, 256, %s4115_s21, [#allocation31], %s3826_s2, %s3826_s2, %s3827_s22  }
  0x84   : > { %s3828_s29 = smov [#allocation11]   ;;  %s3829_s30 = smov [#allocation32]  }
  0x85   : > { %s630_s20 = sshll.u32 %s3828_s29, 4  ;;  %s654_s24 = sshll.u32 %s3829_s30, 4  ;;  %s631_s20 = int_to_ptr.vmem [resolvable:$true] %s630_s20  ;;  %s655_s24 = int_to_ptr.vmem [resolvable:$true] %s654_s24 }
  0x86   : > { %s5120_s14 = sld [smem:[#allocation67_spill]] }
  0x8c   : > { %s3156_s1 = scalar_lea.hbm %s5120_s14, 16 }
  0x8d   : > { %p3157_p6 = scmp.ne.s32.totalorder %s5120_s14, %s3156_s1  ;;  %p3163_p3 = scmp.lt.u32.totalorder %s3156_s1, %s5120_s14 }
  0x8f   : > { %p3159_p1 = pnand %p3157_p6, %p4125_p4 }
  0x91   : > { %p3160_p13 = pneg %p3159_p1 }
  0x93   : > { %p3165_p12 = pnand %p3163_p3, %p3160_p13 }
  0x95   : > { %3168 = shalt.err (!%p3165_p12)
}
  0x96   : > { %s3169_s21 = scalar_lea.vmem %s631_s20, 16  ;;  %s3176_s2 = scalar_lea.vmem %s631_s20, 32 }
  0x97   : > { %p3170_p8 = scmp.ne.s32.totalorder %s631_s20, %s3169_s21  ;;  %p3177_p0 = scmp.lt.s32.totalorder %s631_s20, %s631_s20 }
  0x98   : > { %p3178_p5 = scmp.lt.s32.totalorder %s3176_s2, %s3169_s21 }
  0x99   : > { %p3172_p2 = pnand %p3170_p8, %p4125_p4 }
  0x9a   : > { %p3179_p10 = por %p3178_p5, %p3177_p0 }
  0x9b   : > { %p3173_p11 = pneg %p3172_p2 }
  0x9d   : > { %p3180_p9 = pnand %p3179_p10, %p3173_p11 }
  0x9f   : > { %3183 = shalt.err (!%p3180_p9)
}
  0xa0   : > { %2923 = dma.hbm_to_vmem [thread:$0]  (!%p4111_p7), %s5120_s14, 16, %s631_s20, [#allocation10]  }
  0xa1   : > { %s3184_s1 = scalar_lea.hbm %s5006_s18, 16 }
  0xa2   : > { %p3185_p6 = scmp.ne.s32.totalorder %s5006_s18, %s3184_s1  ;;  %p3191_p3 = scmp.lt.u32.totalorder %s3184_s1, %s5006_s18 }
  0xa4   : > { %p3187_p1 = pnand %p3185_p6, %p4125_p4 }
  0xa6   : > { %p3188_p13 = pneg %p3187_p1 }
  0xa8   : > { %p3193_p12 = pnand %p3191_p3, %p3188_p13 }
  0xaa   : > { %3196 = shalt.err (!%p3193_p12)
}
  0xab   : > { %s3197_s30 = scalar_lea.vmem %s655_s24, 16  ;;  %s3204_s20 = scalar_lea.vmem %s655_s24, 32 }
  0xac   : > { %p3198_p8 = scmp.ne.s32.totalorder %s655_s24, %s3197_s30  ;;  %p3205_p0 = scmp.lt.s32.totalorder %s655_s24, %s655_s24 }
  0xad   : > { %p3206_p5 = scmp.lt.s32.totalorder %s3204_s20, %s3197_s30 }
  0xae   : > { %p3200_p2 = pnand %p3198_p8, %p4125_p4 }
  0xaf   : > { %p3207_p10 = por %p3206_p5, %p3205_p0 }
  0xb0   : > { %p3201_p11 = pneg %p3200_p2 }
  0xb2   : > { %p3208_p9 = pnand %p3207_p10, %p3201_p11 }
  0xb4   : > { %3211 = shalt.err (!%p3208_p9)
}
  0xb5   : > { %2929 = dma.hbm_to_vmem [thread:$0]  (!%p4111_p7), %s5006_s18, 16, %s655_s24, [#allocation31]  }
  0xb6   : > { %p2653_p6 = scmp.ge.s32.totalorder %s3822_s4, 4 }
  0xb7   : > { %s4202_s3 = sand.u32 (!%p2653_p6), 1, %s3802_s25   ;;  %s4205_s21 = sand.u32 (!%p2653_p6), 1, %s3822_s4  }
  0xb8   : > { %661 = sbr.rel (%p2653_p6) target bundleno = 607 (0x25f), region = 32  ;;  %s2656_s2 = sshll.u32 (!%p2653_p6), %s3818_s28, 4 }
  0xb9   : > { %s686_s6 = scalar_lea.vmem (!%p2653_p6), [#allocation6], %s4202_s3  ;;  %s5121_s13 = sld [smem:[#allocation64_spill]] (!%p2653_p6) }
  0xba   : > { %s693_s12 = sshll.u32 (!%p2653_p6), %s686_s6, 4  ;;  %s5051_s1 = scalar_lea.sflag (!%p2653_p6), [#allocation7], %s4205_s21  ;;  %s694_s12 = int_to_ptr.vmem [resolvable:$true] %s693_s12 }
  0xbb   : > { %p5122_p4 = scmp.ne.s32.totalorder (!%p2653_p6), %s5099_s19, 0 }
  0xbf   : > { %s4212_s24 = scalar_lea.hbm %s5121_s13, %s2656_s2  ;;  %s3216_s29 = scalar_lea.hbm %s5121_s13, 32 }
  0xc0   : > { %s3212_s22 = scalar_lea.hbm %s4212_s24, 16  ;;  %p3217_p3 = scmp.lt.u32.totalorder %s4212_s24, %s5121_s13 }
  0xc1   : > { %p3213_p7 = scmp.ne.s32.totalorder %s4212_s24, %s3212_s22  ;;  %p3218_p12 = scmp.lt.u32.totalorder %s3216_s29, %s3212_s22 }
  0xc2   : > { %p3220_p2 = scmp.lt.u32.totalorder %s3212_s22, %s4212_s24 }
  0xc3   : > { %p3214_p1 = pnand %p3213_p7, %p5122_p4  ;;  %p3219_p8 = por %p3218_p12, %p3217_p3 }
  0xc5   : > { %p3215_p13 = pneg %p3214_p1  ;;  %p3221_p11 = por %p3220_p2, %p3219_p8 }
  0xc7   : > { %p3222_p0 = pnand %p3221_p11, %p3215_p13 }
  0xc9   : > { %3225 = shalt.err (!%p3222_p0)
}
  0xca   : > { %s3226_s16 = scalar_lea.vmem %s694_s12, 16  ;;  %s3830_s26 = smov [#allocation6]  }
  0xcb   : > { %p3227_p5 = scmp.ne.s32.totalorder %s694_s12, %s3226_s16  ;;  %s3230_s2 = sshll.u32 %s3830_s26, 4  ;;  %s3231_s2 = int_to_ptr.vmem [resolvable:$false] %s3230_s2 }
  0xcc   : > { %s3232_s6 = scalar_lea.vmem %s3231_s2, 32  ;;  %p3233_p6 = scmp.lt.s32.totalorder %s694_s12, %s3231_s2 }
  0xcd   : > { %p3228_p10 = pnand %p3227_p5, %p5122_p4  ;;  %p3234_p7 = scmp.lt.s32.totalorder %s3232_s6, %s3226_s16 }
  0xcf   : > { %p3229_p9 = pneg %p3228_p10  ;;  %p3235_p1 = por %p3234_p7, %p3233_p6 }
  0xd1   : > { %p3236_p3 = pnand %p3235_p1, %p3229_p9 }
  0xd3   : > { %3239 = shalt.err (!%p3236_p3)
}
  0xd4   : > { %2876 = dma.hbm_to_vmem [thread:$0]  (%p5122_p4), %s4212_s24, 16, %s694_s12, %s5051_s1  }
  0xd5   : > { %s4235_s15 = sand.u32 1, %s3790_s23   ;;  %s4241_s22 = sshll.u32 %s3814_s27, 8 }
  0xd6   : > { %s4238_s11 = sshll.u32 %s4235_s15, 4  ;;  %s5123_s5 = sld [smem:[#allocation68_spill]] }
  0xd7   : > { %s722_s30 = scalar_lea.vmem [#allocation12], %s4238_s11  ;;  %s5052_s24 = scalar_lea.sflag [#allocation13], %s4205_s21 }
  0xd8   : > { %s729_s12 = sshll.u32 %s722_s30, 4  ;;  %p5124_p12 = scmp.ne.s32.totalorder %s5105_s10, 0  ;;  %s4250_s12 = int_to_ptr.vmem [resolvable:$true] %s729_s12 }
  0xdc   : > { %s4247_s29 = scalar_lea.hbm %s5123_s5, %s4241_s22  ;;  %s3244_s2 = scalar_lea.hbm %s5123_s5, 512 }
  0xdd   : > { %s3240_s20 = scalar_lea.hbm %s4247_s29, 256  ;;  %p3245_p11 = scmp.lt.u32.totalorder %s4247_s29, %s5123_s5 }
  0xde   : > { %p3241_p13 = scmp.ne.s32.totalorder %s4247_s29, %s3240_s20  ;;  %p3246_p0 = scmp.lt.u32.totalorder %s3244_s2, %s3240_s20 }
  0xdf   : > { %p3248_p10 = scmp.lt.u32.totalorder %s3240_s20, %s4247_s29 }
  0xe0   : > { %p3242_p8 = pnand %p3241_p13, %p5124_p12  ;;  %p3247_p5 = por %p3246_p0, %p3245_p11 }
  0xe2   : > { %p3243_p2 = pneg %p3242_p8  ;;  %p3249_p9 = por %p3248_p10, %p3247_p5 }
  0xe4   : > { %p3250_p6 = pnand %p3249_p9, %p3243_p2 }
  0xe6   : > { %3253 = shalt.err (!%p3250_p6)
}
  0xe7   : > { %s3254_s8 = scalar_lea.vmem %s4250_s12, 256  ;;  %s3831_s30 = smov [#allocation12]  }
  0xe8   : > { %p3255_p7 = scmp.ne.s32.totalorder %s4250_s12, %s3254_s8  ;;  %s3258_s16 = sshll.u32 %s3831_s30, 4  ;;  %s3259_s16 = int_to_ptr.vmem [resolvable:$false] %s3258_s16 }
  0xe9   : > { %s3260_s26 = scalar_lea.vmem %s3259_s16, 512  ;;  %p3261_p13 = scmp.lt.s32.totalorder %s4250_s12, %s3259_s16 }
  0xea   : > { %p3256_p1 = pnand %p3255_p7, %p5124_p12  ;;  %p3262_p8 = scmp.lt.s32.totalorder %s3260_s26, %s3254_s8 }
  0xec   : > { %p3257_p3 = pneg %p3256_p1  ;;  %p3263_p11 = por %p3262_p8, %p3261_p13 }
  0xee   : > { %p3264_p0 = pnand %p3263_p11, %p3257_p3 }
  0xf0   : > { %3267 = shalt.err (!%p3264_p0)
}
  0xf1   : > { %s5054_s20 = smov 64   ;;  %s3833_s2 = smov 4  }
  0xf2   : > { %2878 = dma.hbm_to_vmem [thread:$0]  (%p5124_p12), %s4247_s29, 256, %s4250_s12, %s5052_s24, %s5054_s20, %s5054_s20, %s3833_s2  }
  0xf3   : > { %s5125_s7 = sld [smem:[#allocation70_spill]]  ;;  %s760_s30 = scalar_lea.vmem [#allocation15], %s4238_s11 }
  0xf4   : > { %s767_s16 = sshll.u32 %s760_s30, 4  ;;  %s4289_s26 = sshll.u32 %s3814_s27, 4  ;;  %s4286_s16 = int_to_ptr.vmem [resolvable:$true] %s767_s16 }
  0xf5   : > { %s5053_s1 = scalar_lea.sflag [#allocation16], %s4205_s21 }
  0xf9   : > { %s4283_s8 = scalar_lea.hbm %s5125_s7, %s4241_s22  ;;  %s3272_s6 = scalar_lea.hbm %s5125_s7, 512 }
  0xfa   : > { %s3268_s5 = scalar_lea.hbm %s4283_s8, 256  ;;  %p3273_p9 = scmp.lt.u32.totalorder %s4283_s8, %s5125_s7 }
  0xfb   : > { %p3269_p2 = scmp.ne.s32.totalorder %s4283_s8, %s3268_s5  ;;  %p3274_p6 = scmp.lt.u32.totalorder %s3272_s6, %s3268_s5 }
  0xfc   : > { %p3276_p1 = scmp.lt.u32.totalorder %s3268_s5, %s4283_s8 }
  0xfd   : > { %p3270_p5 = pnand %p3269_p2, %p5124_p12  ;;  %p3275_p7 = por %p3274_p6, %p3273_p9 }
  0xff   : > { %p3271_p10 = pneg %p3270_p5  ;;  %p3277_p3 = por %p3276_p1, %p3275_p7 }
 0x101   : > { %p3278_p13 = pnand %p3277_p3, %p3271_p10 }
 0x103   : > { %3281 = shalt.err (!%p3278_p13)
}
 0x104   : > { %s3282_s30 = scalar_lea.vmem %s4286_s16, 256  ;;  %s3834_s29 = smov [#allocation15]  }
 0x105   : > { %p3283_p8 = scmp.ne.s32.totalorder %s4286_s16, %s3282_s30  ;;  %s3286_s12 = sshll.u32 %s3834_s29, 4  ;;  %s3287_s12 = int_to_ptr.vmem [resolvable:$false] %s3286_s12 }
 0x106   : > { %s3288_s24 = scalar_lea.vmem %s3287_s12, 512  ;;  %p3289_p2 = scmp.lt.s32.totalorder %s4286_s16, %s3287_s12 }
 0x107   : > { %p3284_p11 = pnand %p3283_p8, %p5124_p12  ;;  %p3290_p5 = scmp.lt.s32.totalorder %s3288_s24, %s3282_s30 }
 0x109   : > { %p3285_p0 = pneg %p3284_p11  ;;  %p3291_p9 = por %p3290_p5, %p3289_p2 }
 0x10b   : > { %p3292_p6 = pnand %p3291_p9, %p3285_p0 }
 0x10d   : > { %3295 = shalt.err (!%p3292_p6)
}
 0x10e   : > { %2880 = dma.hbm_to_vmem [thread:$0]  (%p5124_p12), %s4283_s8, 256, %s4286_s16, %s5053_s1, %s5054_s20, %s5054_s20, %s3833_s2  }
 0x10f   : > { %s5126_s9 = sld [smem:[#allocation72_spill]]  ;;  %s797_s30 = scalar_lea.vmem [#allocation18], %s4235_s15 }
 0x110   : > { %s804_s29 = sshll.u32 %s797_s30, 4  ;;  %s5057_s12 = scalar_lea.sflag [#allocation19], %s4205_s21  ;;  %s805_s29 = int_to_ptr.vmem [resolvable:$true] %s804_s29 }
 0x115   : > { %s4322_s0 = scalar_lea.hbm %s5126_s9, %s4289_s26  ;;  %s3300_s16 = scalar_lea.hbm %s5126_s9, 32 }
 0x116   : > { %s3296_s24 = scalar_lea.hbm %s4322_s0, 16  ;;  %p3301_p3 = scmp.lt.u32.totalorder %s4322_s0, %s5126_s9 }
 0x117   : > { %p3297_p10 = scmp.ne.s32.totalorder %s4322_s0, %s3296_s24  ;;  %p3302_p13 = scmp.lt.u32.totalorder %s3300_s16, %s3296_s24 }
 0x118   : > { %p3304_p11 = scmp.lt.u32.totalorder %s3296_s24, %s4322_s0 }
 0x119   : > { %p3298_p7 = pnand %p3297_p10, %p5124_p12  ;;  %p3303_p8 = por %p3302_p13, %p3301_p3 }
 0x11b   : > { %p3299_p1 = pneg %p3298_p7  ;;  %p3305_p0 = por %p3304_p11, %p3303_p8 }
 0x11d   : > { %p3306_p2 = pnand %p3305_p0, %p3299_p1 }
 0x11f   : > { %3309 = shalt.err (!%p3306_p2)
}
 0x120   : > { %s3310_s30 = scalar_lea.vmem %s805_s29, 16  ;;  %s3835_s1 = smov [#allocation18]  }
 0x121   : > { %p3311_p5 = scmp.ne.s32.totalorder %s805_s29, %s3310_s30  ;;  %s3314_s20 = sshll.u32 %s3835_s1, 4  ;;  %s3315_s20 = int_to_ptr.vmem [resolvable:$false] %s3314_s20 }
 0x122   : > { %s3316_s7 = scalar_lea.vmem %s3315_s20, 32  ;;  %p3317_p10 = scmp.lt.s32.totalorder %s805_s29, %s3315_s20 }
 0x123   : > { %p3312_p9 = pnand %p3311_p5, %p5124_p12  ;;  %p3318_p7 = scmp.lt.s32.totalorder %s3316_s7, %s3310_s30 }
 0x125   : > { %p3313_p6 = pneg %p3312_p9  ;;  %p3319_p4 = por %p3318_p7, %p3317_p10 }
 0x127   : > { %p3320_p3 = pnand %p3319_p4, %p3313_p6 }
 0x129   : > { %3323 = shalt.err (!%p3320_p3)
}
 0x12a   : > { %2882 = dma.hbm_to_vmem [thread:$0]  (%p5124_p12), %s4322_s0, 16, %s805_s29, %s5057_s12  }
 0x12b   : > { %s5127_s8 = sld [smem:[#allocation74_spill]]  ;;  %s832_s20 = scalar_lea.vmem [#allocation21], %s4238_s11 }
 0x12c   : > { %s839_s5 = sshll.u32 %s832_s20, 4  ;;  %s2673_s6 = sshll.u32 %s4235_s15, 5  ;;  %s4352_s5 = int_to_ptr.vmem [resolvable:$true] %s839_s5 }
 0x12d   : > { %s5059_s30 = scalar_lea.sflag [#allocation22], %s4205_s21 }
 0x131   : > { %s4349_s16 = scalar_lea.hbm %s5127_s8, %s4241_s22  ;;  %s3328_s22 = scalar_lea.hbm %s5127_s8, 512 }
 0x132   : > { %s3324_s7 = scalar_lea.hbm %s4349_s16, 256  ;;  %p3329_p8 = scmp.lt.u32.totalorder %s4349_s16, %s5127_s8 }
 0x133   : > { %p3325_p4 = scmp.ne.s32.totalorder %s4349_s16, %s3324_s7  ;;  %p3330_p11 = scmp.lt.u32.totalorder %s3328_s22, %s3324_s7 }
 0x134   : > { %p3332_p2 = scmp.lt.u32.totalorder %s3324_s7, %s4349_s16 }
 0x135   : > { %p3326_p1 = pnand %p3325_p4, %p5124_p12  ;;  %p3331_p0 = por %p3330_p11, %p3329_p8 }
 0x137   : > { %p3327_p13 = pneg %p3326_p1  ;;  %p3333_p5 = por %p3332_p2, %p3331_p0 }
 0x139   : > { %p3334_p9 = pnand %p3333_p5, %p3327_p13 }
 0x13b   : > { %3337 = shalt.err (!%p3334_p9)
}
 0x13c   : > { %s3338_s11 = scalar_lea.vmem %s4352_s5, 256  ;;  %s3836_s20 = smov [#allocation21]  }
 0x13d   : > { %p3339_p6 = scmp.ne.s32.totalorder %s4352_s5, %s3338_s11  ;;  %s3342_s0 = sshll.u32 %s3836_s20, 4  ;;  %s3343_s0 = int_to_ptr.vmem [resolvable:$false] %s3342_s0 }
 0x13e   : > { %s3344_s29 = scalar_lea.vmem %s3343_s0, 512  ;;  %p3345_p3 = scmp.lt.s32.totalorder %s4352_s5, %s3343_s0 }
 0x13f   : > { %p3340_p10 = pnand %p3339_p6, %p5124_p12  ;;  %p3346_p4 = scmp.lt.s32.totalorder %s3344_s29, %s3338_s11 }
 0x141   : > { %p3341_p7 = pneg %p3340_p10  ;;  %p3347_p1 = por %p3346_p4, %p3345_p3 }
 0x143   : > { %p3348_p8 = pnand %p3347_p1, %p3341_p7 }
 0x145   : > { %3351 = shalt.err (!%p3348_p8)
}
 0x146   : > { %s5128_s7 = smov 64   ;;  %s2741_s22 = sshll.u32 %s3814_s27, 9 }
 0x147   : > { %2884 = dma.hbm_to_vmem [thread:$0]  (%p5124_p12), %s4349_s16, 256, %s4352_s5, %s5059_s30, %s5128_s7, %s5128_s7, %s3833_s2  }
 0x148   : > { %s5129_s11 = sld [smem:[#allocation76_spill]]  ;;  %s870_s0 = scalar_lea.vmem [#allocation24], %s2673_s6 }
 0x149   : > { %s877_s29 = sshll.u32 %s870_s0, 4  ;;  %s5061_s12 = scalar_lea.sflag [#allocation25], %s4205_s21  ;;  %s4390_s29 = int_to_ptr.vmem [resolvable:$true] %s877_s29 }
 0x14e   : > { %s4386_s20 = scalar_lea.hbm %s5129_s11, %s2741_s22  ;;  %s3356_s22 = scalar_lea.hbm %s5129_s11, 1024 }
 0x14f   : > { %s3352_s8 = scalar_lea.hbm %s4386_s20, 512  ;;  %p3357_p2 = scmp.lt.u32.totalorder %s4386_s20, %s5129_s11 }
 0x150   : > { %p3353_p13 = scmp.ne.s32.totalorder %s4386_s20, %s3352_s8  ;;  %p3358_p5 = scmp.lt.u32.totalorder %s3356_s22, %s3352_s8 }
 0x151   : > { %p3360_p6 = scmp.lt.u32.totalorder %s3352_s8, %s4386_s20 }
 0x152   : > { %p3354_p11 = pnand %p3353_p13, %p5124_p12  ;;  %p3359_p9 = por %p3358_p5, %p3357_p2 }
 0x154   : > { %p3355_p0 = pneg %p3354_p11  ;;  %p3361_p10 = por %p3360_p6, %p3359_p9 }
 0x156   : > { %p3362_p7 = pnand %p3361_p10, %p3355_p0 }
 0x158   : > { %3365 = shalt.err (!%p3362_p7)
}
 0x159   : > { %s3366_s6 = scalar_lea.vmem %s4390_s29, 512  ;;  %s3837_s0 = smov [#allocation24]  }
 0x15a   : > { %p3367_p3 = scmp.ne.s32.totalorder %s4390_s29, %s3366_s6  ;;  %s3370_s16 = sshll.u32 %s3837_s0, 4  ;;  %s3371_s16 = int_to_ptr.vmem [resolvable:$false] %s3370_s16 }
 0x15b   : > { %s3372_s5 = scalar_lea.vmem %s3371_s16, 1024  ;;  %p3373_p8 = scmp.lt.s32.totalorder %s4390_s29, %s3371_s16 }
 0x15c   : > { %p3368_p4 = pnand %p3367_p3, %p5124_p12  ;;  %p3374_p13 = scmp.lt.s32.totalorder %s3372_s5, %s3366_s6 }
 0x15e   : > { %p3369_p1 = pneg %p3368_p4  ;;  %p3375_p11 = por %p3374_p13, %p3373_p8 }
 0x160   : > { %p3376_p2 = pnand %p3375_p11, %p3369_p1 }
 0x162   : > { %3379 = shalt.err (!%p3376_p2)
}
 0x163   : > { %2886 = dma.hbm_to_vmem [thread:$0]  (%p5124_p12), %s4386_s20, 512, %s4390_s29, %s5061_s12, %s5128_s7, %s5128_s7, %s3833_s2  }
 0x164   : > { %s5130_s24 = sld [smem:[#allocation78_spill]]  ;;  %s907_s0 = scalar_lea.vmem [#allocation27], %s4235_s15 }
 0x165   : > { %s914_s16 = sshll.u32 %s907_s0, 4  ;;  %s5062_s5 = sshll.u32 %s4202_s3, 3  ;;  %s4426_s16 = int_to_ptr.vmem [resolvable:$true] %s914_s16 }
 0x166   : > { %s5060_s30 = scalar_lea.sflag [#allocation28], %s4205_s21 }
 0x16a   : > { %s5131_s6 = smov %s5130_s24  ;;  %s4423_s1 = scalar_lea.hbm %s5130_s24, %s4289_s26 }
 0x16b   : > { %s3380_s9 = scalar_lea.hbm %s4423_s1, 16  ;;  %s3384_s20 = scalar_lea.hbm %s5131_s6, 32 }
 0x16c   : > { %p3381_p0 = scmp.ne.s32.totalorder %s4423_s1, %s3380_s9  ;;  %p3385_p6 = scmp.lt.u32.totalorder %s4423_s1, %s5131_s6 }
 0x16d   : > { %p3386_p10 = scmp.lt.u32.totalorder %s3384_s20, %s3380_s9  ;;  %p3388_p3 = scmp.lt.u32.totalorder %s3380_s9, %s4423_s1 }
 0x16e   : > { %p3382_p5 = pnand %p3381_p0, %p5124_p12 }
 0x16f   : > { %p3387_p7 = por %p3386_p10, %p3385_p6 }
 0x170   : > { %p3383_p9 = pneg %p3382_p5 }
 0x171   : > { %p3389_p4 = por %p3388_p3, %p3387_p7 }
 0x173   : > { %p3390_p1 = pnand %p3389_p4, %p3383_p9 }
 0x175   : > { %3393 = shalt.err (!%p3390_p1)
}
 0x176   : > { %s3394_s22 = scalar_lea.vmem %s4426_s16, 16  ;;  %s3838_s24 = smov [#allocation27]  }
 0x177   : > { %p3395_p8 = scmp.ne.s32.totalorder %s4426_s16, %s3394_s22  ;;  %s3398_s0 = sshll.u32 %s3838_s24, 4  ;;  %s3399_s0 = int_to_ptr.vmem [resolvable:$false] %s3398_s0 }
 0x178   : > { %s3400_s2 = scalar_lea.vmem %s3399_s0, 32  ;;  %p3401_p2 = scmp.lt.s32.totalorder %s4426_s16, %s3399_s0 }
 0x179   : > { %p3396_p13 = pnand %p3395_p8, %p5124_p12  ;;  %p3402_p0 = scmp.lt.s32.totalorder %s3400_s2, %s3394_s22 }
 0x17b   : > { %p3397_p11 = pneg %p3396_p13  ;;  %p3403_p5 = por %p3402_p0, %p3401_p2 }
 0x17d   : > { %p3404_p6 = pnand %p3403_p5, %p3397_p11 }
 0x17f   : > { %3407 = shalt.err (!%p3404_p6)
}
 0x180   : > { %2888 = dma.hbm_to_vmem [thread:$0]  (%p5124_p12), %s4423_s1, 16, %s4426_s16, %s5060_s30  }
 0x181   : > { %s2655_s9 = sshll.u32 %s3818_s28, 7  ;;  %s5132_s29 = sld [smem:[#allocation63_spill]] }
 0x182   : > { %s669_s22 = scalar_lea.vmem [#allocation3], %s5062_s5  ;;  %s666_s0 = scalar_lea.sflag [#allocation4], %s4202_s3 }
 0x183   : > { %s676_s24 = sshll.u32 %s669_s22, 4  ;;  %p5133_p10 = scmp.ne.s32.totalorder %s5099_s19, 0  ;;  %s677_s24 = int_to_ptr.vmem [resolvable:$true] %s676_s24 }
 0x187   : > { %s4459_s8 = scalar_lea.hbm %s5132_s29, %s2655_s9  ;;  %s3412_s7 = scalar_lea.hbm %s5132_s29, 256 }
 0x188   : > { %s3408_s2 = scalar_lea.hbm %s4459_s8, 128  ;;  %p3413_p4 = scmp.lt.u32.totalorder %s4459_s8, %s5132_s29 }
 0x189   : > { %p3409_p9 = scmp.ne.s32.totalorder %s4459_s8, %s3408_s2  ;;  %p3414_p1 = scmp.lt.u32.totalorder %s3412_s7, %s3408_s2 }
 0x18a   : > { %p3416_p13 = scmp.lt.u32.totalorder %s3408_s2, %s4459_s8 }
 0x18b   : > { %p3410_p7 = pnand %p3409_p9, %p5133_p10  ;;  %p3415_p8 = por %p3414_p1, %p3413_p4 }
 0x18d   : > { %p3411_p3 = pneg %p3410_p7  ;;  %p3417_p11 = por %p3416_p13, %p3415_p8 }
 0x18f   : > { %p3418_p2 = pnand %p3417_p11, %p3411_p3 }
 0x191   : > { %3421 = shalt.err (!%p3418_p2)
}
 0x192   : > { %s3422_s22 = scalar_lea.vmem %s677_s24, 128  ;;  %s3839_s12 = smov [#allocation3]  }
 0x193   : > { %p3423_p0 = scmp.ne.s32.totalorder %s677_s24, %s3422_s22  ;;  %s3426_s5 = sshll.u32 %s3839_s12, 4  ;;  %s3427_s5 = int_to_ptr.vmem [resolvable:$false] %s3426_s5 }
 0x194   : > { %s3428_s1 = scalar_lea.vmem %s3427_s5, 256  ;;  %p3429_p9 = scmp.lt.s32.totalorder %s677_s24, %s3427_s5 }
 0x195   : > { %p3424_p5 = pnand %p3423_p0, %p5133_p10  ;;  %p3430_p7 = scmp.lt.s32.totalorder %s3428_s1, %s3422_s22 }
 0x197   : > { %p3425_p6 = pneg %p3424_p5  ;;  %p3431_p12 = por %p3430_p7, %p3429_p9 }
 0x199   : > { %p3432_p1 = pnand %p3431_p12, %p3425_p6 }
 0x19b   : > { %3435 = shalt.err (!%p3432_p1)
}
 0x19c   : > { %2875 = dma.hbm_to_vmem [thread:$0]  (%p5133_p10), %s4459_s8, 128, %s677_s24, %s666_s0  }
 0x19d   : > { %s5134_s16 = sld [smem:[#allocation65_spill]]  ;;  %s5135_s12 = sshll.u32 %s4202_s3, 3 }
 0x19e   : > { %s704_s5 = scalar_lea.vmem [#allocation8], %s5135_s12 }
 0x19f   : > { %s711_s20 = sshll.u32 %s704_s5, 4  ;;  %s712_s20 = int_to_ptr.vmem [resolvable:$true] %s711_s20 }
 0x1a3   : > { %s4486_s7 = scalar_lea.hbm %s5134_s16, %s2655_s9  ;;  %s3440_s0 = scalar_lea.hbm %s5134_s16, 256 }
 0x1a4   : > { %s3436_s22 = scalar_lea.hbm %s4486_s7, 128  ;;  %p3441_p8 = scmp.lt.u32.totalorder %s4486_s7, %s5134_s16 }
 0x1a5   : > { %p3437_p12 = scmp.ne.s32.totalorder %s4486_s7, %s3436_s22  ;;  %p3442_p13 = scmp.lt.u32.totalorder %s3440_s0, %s3436_s22 }
 0x1a6   : > { %p3444_p2 = scmp.lt.u32.totalorder %s3436_s22, %s4486_s7 }
 0x1a7   : > { %p3438_p3 = pnand %p3437_p12, %p5133_p10  ;;  %p3443_p11 = por %p3442_p13, %p3441_p8 }
 0x1a9   : > { %p3439_p4 = pneg %p3438_p3  ;;  %p3445_p0 = por %p3444_p2, %p3443_p11 }
 0x1ab   : > { %p3446_p5 = pnand %p3445_p0, %p3439_p4 }
 0x1ad   : > { %3449 = shalt.err (!%p3446_p5)
}
 0x1ae   : > { %s3450_s3 = scalar_lea.vmem %s712_s20, 128  ;;  %s3840_s30 = smov [#allocation8]  }
 0x1af   : > { %p3451_p6 = scmp.ne.s32.totalorder %s712_s20, %s3450_s3  ;;  %s3454_s2 = sshll.u32 %s3840_s30, 4  ;;  %s3455_s2 = int_to_ptr.vmem [resolvable:$false] %s3454_s2 }
 0x1b0   : > { %s3456_s12 = scalar_lea.vmem %s3455_s2, 256  ;;  %p3457_p1 = scmp.lt.s32.totalorder %s712_s20, %s3455_s2 }
 0x1b1   : > { %p3452_p9 = pnand %p3451_p6, %p5133_p10  ;;  %p3458_p12 = scmp.lt.s32.totalorder %s3456_s12, %s3450_s3 }
 0x1b3   : > { %p3453_p7 = pneg %p3452_p9  ;;  %p3459_p3 = por %p3458_p12, %p3457_p1 }
 0x1b5   : > { %p3460_p8 = pnand %p3459_p3, %p3453_p7 }
 0x1b7   : > { %3463 = shalt.err (!%p3460_p8)
}
 0x1b8   : > { %s5136_s5 = scalar_lea.sflag [#allocation7], %s4205_s21  ;;  %s5137_s24 = sld [smem:[#allocation69_spill]] }
 0x1b9   : > { %2877 = dma.hbm_to_vmem [thread:$0]  (%p5133_p10), %s4486_s7, 128, %s712_s20, %s5136_s5  }
 0x1ba   : > { %s742_s9 = scalar_lea.vmem [#allocation14], %s4235_s15  ;;  %p5139_p13 = scmp.ne.s32.totalorder %s5105_s10, 0 }
 0x1bb   : > { %s749_s3 = sshll.u32 %s742_s9, 4  ;;  %s750_s3 = int_to_ptr.vmem [resolvable:$true] %s749_s3 }
 0x1be   : > { %s5138_s0 = smov %s5137_s24  ;;  %s4513_s1 = scalar_lea.hbm %s5137_s24, %s4289_s26 }
 0x1bf   : > { %s3464_s19 = scalar_lea.hbm %s4513_s1, 16  ;;  %s3468_s7 = scalar_lea.hbm %s5138_s0, 32 }
 0x1c0   : > { %p3465_p4 = scmp.ne.s32.totalorder %s4513_s1, %s3464_s19  ;;  %p3469_p10 = scmp.lt.u32.totalorder %s4513_s1, %s5138_s0 }
 0x1c1   : > { %p3470_p0 = scmp.lt.u32.totalorder %s3468_s7, %s3464_s19  ;;  %p3472_p6 = scmp.lt.u32.totalorder %s3464_s19, %s4513_s1 }
 0x1c2   : > { %p3466_p11 = pnand %p3465_p4, %p5139_p13 }
 0x1c3   : > { %p3471_p5 = por %p3470_p0, %p3469_p10 }
 0x1c4   : > { %p3467_p2 = pneg %p3466_p11 }
 0x1c5   : > { %p3473_p9 = por %p3472_p6, %p3471_p5 }
 0x1c7   : > { %p3474_p7 = pnand %p3473_p9, %p3467_p2 }
 0x1c9   : > { %3477 = shalt.err (!%p3474_p7)
}
 0x1ca   : > { %s3478_s5 = scalar_lea.vmem %s750_s3, 16  ;;  %s3841_s22 = smov [#allocation14]  }
 0x1cb   : > { %p3479_p1 = scmp.ne.s32.totalorder %s750_s3, %s3478_s5  ;;  %s3482_s8 = sshll.u32 %s3841_s22, 4  ;;  %s3483_s8 = int_to_ptr.vmem [resolvable:$false] %s3482_s8 }
 0x1cc   : > { %s3484_s24 = scalar_lea.vmem %s3483_s8, 32  ;;  %p3485_p8 = scmp.lt.s32.totalorder %s750_s3, %s3483_s8 }
 0x1cd   : > { %p3480_p12 = pnand %p3479_p1, %p5139_p13  ;;  %p3486_p4 = scmp.lt.s32.totalorder %s3484_s24, %s3478_s5 }
 0x1cf   : > { %p3481_p3 = pneg %p3480_p12  ;;  %p3487_p11 = por %p3486_p4, %p3485_p8 }
 0x1d1   : > { %p3488_p0 = pnand %p3487_p11, %p3481_p3 }
 0x1d3   : > { %3491 = shalt.err (!%p3488_p0)
}
 0x1d4   : > { %s5140_s9 = scalar_lea.sflag [#allocation13], %s4205_s21  ;;  %s5141_s2 = sld [smem:[#allocation71_spill]] }
 0x1d5   : > { %2879 = dma.hbm_to_vmem [thread:$0]  (%p5139_p13), %s4513_s1, 16, %s750_s3, %s5140_s9  }
 0x1d6   : > { %s780_s12 = scalar_lea.vmem [#allocation17], %s4235_s15 }
 0x1d7   : > { %s787_s5 = sshll.u32 %s780_s12, 4  ;;  %s788_s5 = int_to_ptr.vmem [resolvable:$true] %s787_s5 }
 0x1da   : > { %s5142_s7 = smov %s5141_s2  ;;  %s4539_s20 = scalar_lea.hbm %s5141_s2, %s4289_s26 }
 0x1db   : > { %s3492_s22 = scalar_lea.hbm %s4539_s20, 16  ;;  %s3496_s1 = scalar_lea.hbm %s5142_s7, 32 }
 0x1dc   : > { %p3493_p2 = scmp.ne.s32.totalorder %s4539_s20, %s3492_s22  ;;  %p3497_p6 = scmp.lt.u32.totalorder %s4539_s20, %s5142_s7 }
 0x1dd   : > { %p3498_p9 = scmp.lt.u32.totalorder %s3496_s1, %s3492_s22  ;;  %p3500_p1 = scmp.lt.u32.totalorder %s3492_s22, %s4539_s20 }
 0x1de   : > { %p3494_p10 = pnand %p3493_p2, %p5139_p13 }
 0x1df   : > { %p3499_p7 = por %p3498_p9, %p3497_p6 }
 0x1e0   : > { %p3495_p5 = pneg %p3494_p10 }
 0x1e1   : > { %p3501_p12 = por %p3500_p1, %p3499_p7 }
 0x1e3   : > { %p3502_p3 = pnand %p3501_p12, %p3495_p5 }
 0x1e5   : > { %3505 = shalt.err (!%p3502_p3)
}
 0x1e6   : > { %s3506_s19 = scalar_lea.vmem %s788_s5, 16  ;;  %s3842_s30 = smov [#allocation17]  }
 0x1e7   : > { %p3507_p8 = scmp.ne.s32.totalorder %s788_s5, %s3506_s19  ;;  %s3510_s2 = sshll.u32 %s3842_s30, 4  ;;  %s3511_s2 = int_to_ptr.vmem [resolvable:$false] %s3510_s2 }
 0x1e8   : > { %s3512_s12 = scalar_lea.vmem %s3511_s2, 32  ;;  %p3513_p0 = scmp.lt.s32.totalorder %s788_s5, %s3511_s2 }
 0x1e9   : > { %p3508_p4 = pnand %p3507_p8, %p5139_p13  ;;  %p3514_p2 = scmp.lt.s32.totalorder %s3512_s12, %s3506_s19 }
 0x1eb   : > { %p3509_p11 = pneg %p3508_p4  ;;  %p3515_p10 = por %p3514_p2, %p3513_p0 }
 0x1ed   : > { %p3516_p6 = pnand %p3515_p10, %p3509_p11 }
 0x1ef   : > { %3519 = shalt.err (!%p3516_p6)
}
 0x1f0   : > { %s5143_s22 = scalar_lea.sflag [#allocation16], %s4205_s21  ;;  %s5144_s1 = sld [smem:[#allocation73_spill]] }
 0x1f1   : > { %2881 = dma.hbm_to_vmem [thread:$0]  (%p5139_p13), %s4539_s20, 16, %s788_s5, %s5143_s22  }
 0x1f2   : > { %s814_s19 = scalar_lea.vmem [#allocation20], %s4235_s15 }
 0x1f3   : > { %s821_s30 = sshll.u32 %s814_s19, 4  ;;  %s822_s30 = int_to_ptr.vmem [resolvable:$true] %s821_s30 }
 0x1f6   : > { %s5145_s9 = smov %s5144_s1  ;;  %s4565_s3 = scalar_lea.hbm %s5144_s1, %s4289_s26 }
 0x1f7   : > { %s3520_s2 = scalar_lea.hbm %s4565_s3, 16  ;;  %s3524_s20 = scalar_lea.hbm %s5145_s9, 32 }
 0x1f8   : > { %p3521_p5 = scmp.ne.s32.totalorder %s4565_s3, %s3520_s2  ;;  %p3525_p1 = scmp.lt.u32.totalorder %s4565_s3, %s5145_s9 }
 0x1f9   : > { %p3526_p12 = scmp.lt.u32.totalorder %s3524_s20, %s3520_s2  ;;  %p3528_p8 = scmp.lt.u32.totalorder %s3520_s2, %s4565_s3 }
 0x1fa   : > { %p3522_p9 = pnand %p3521_p5, %p5139_p13 }
 0x1fb   : > { %p3527_p3 = por %p3526_p12, %p3525_p1 }
 0x1fc   : > { %p3523_p7 = pneg %p3522_p9 }
 0x1fd   : > { %p3529_p4 = por %p3528_p8, %p3527_p3 }
 0x1ff   : > { %p3530_p11 = pnand %p3529_p4, %p3523_p7 }
 0x201   : > { %3533 = shalt.err (!%p3530_p11)
}
 0x202   : > { %s3534_s8 = scalar_lea.vmem %s822_s30, 16  ;;  %s3843_s24 = smov [#allocation20]  }
 0x203   : > { %p3535_p0 = scmp.ne.s32.totalorder %s822_s30, %s3534_s8  ;;  %s3538_s1 = sshll.u32 %s3843_s24, 4  ;;  %s3539_s1 = int_to_ptr.vmem [resolvable:$false] %s3538_s1 }
 0x204   : > { %s3540_s0 = scalar_lea.vmem %s3539_s1, 32  ;;  %p3541_p6 = scmp.lt.s32.totalorder %s822_s30, %s3539_s1 }
 0x205   : > { %p3536_p2 = pnand %p3535_p0, %p5139_p13  ;;  %p3542_p5 = scmp.lt.s32.totalorder %s3540_s0, %s3534_s8 }
 0x207   : > { %p3537_p10 = pneg %p3536_p2  ;;  %p3543_p9 = por %p3542_p5, %p3541_p6 }
 0x209   : > { %p3544_p1 = pnand %p3543_p9, %p3537_p10 }
 0x20b   : > { %3547 = shalt.err (!%p3544_p1)
}
 0x20c   : > { %s5146_s19 = scalar_lea.sflag [#allocation19], %s4205_s21  ;;  %s5147_s20 = sld [smem:[#allocation75_spill]] }
 0x20d   : > { %2883 = dma.hbm_to_vmem [thread:$0]  (%p5139_p13), %s4565_s3, 16, %s822_s30, %s5146_s19  }
 0x20e   : > { %s852_s22 = scalar_lea.vmem [#allocation23], %s4235_s15 }
 0x20f   : > { %s859_s8 = sshll.u32 %s852_s22, 4  ;;  %s860_s8 = int_to_ptr.vmem [resolvable:$true] %s859_s8 }
 0x212   : > { %s4591_s5 = scalar_lea.hbm %s5147_s20, %s4289_s26  ;;  %s3552_s3 = scalar_lea.hbm %s5147_s20, 32 }
 0x213   : > { %s3548_s24 = scalar_lea.hbm %s4591_s5, 16  ;;  %p3553_p8 = scmp.lt.u32.totalorder %s4591_s5, %s5147_s20 }
 0x214   : > { %p3549_p7 = scmp.ne.s32.totalorder %s4591_s5, %s3548_s24  ;;  %p3554_p4 = scmp.lt.u32.totalorder %s3552_s3, %s3548_s24 }
 0x215   : > { %p3556_p0 = scmp.lt.u32.totalorder %s3548_s24, %s4591_s5 }
 0x216   : > { %p3550_p12 = pnand %p3549_p7, %p5139_p13  ;;  %p3555_p11 = por %p3554_p4, %p3553_p8 }
 0x218   : > { %p3551_p3 = pneg %p3550_p12  ;;  %p3557_p2 = por %p3556_p0, %p3555_p11 }
 0x21a   : > { %p3558_p10 = pnand %p3557_p2, %p3551_p3 }
 0x21c   : > { %3561 = shalt.err (!%p3558_p10)
}
 0x21d   : > { %s3562_s2 = scalar_lea.vmem %s860_s8, 16  ;;  %s3844_s12 = smov [#allocation23]  }
 0x21e   : > { %p3563_p6 = scmp.ne.s32.totalorder %s860_s8, %s3562_s2  ;;  %s3566_s22 = sshll.u32 %s3844_s12, 4  ;;  %s3567_s22 = int_to_ptr.vmem [resolvable:$false] %s3566_s22 }
 0x21f   : > { %s3568_s1 = scalar_lea.vmem %s3567_s22, 32  ;;  %p3569_p1 = scmp.lt.s32.totalorder %s860_s8, %s3567_s22 }
 0x220   : > { %p3564_p5 = pnand %p3563_p6, %p5139_p13  ;;  %p3570_p7 = scmp.lt.s32.totalorder %s3568_s1, %s3562_s2 }
 0x222   : > { %p3565_p9 = pneg %p3564_p5  ;;  %p3571_p12 = por %p3570_p7, %p3569_p1 }
 0x224   : > { %p3572_p4 = pnand %p3571_p12, %p3565_p9 }
 0x226   : > { %3575 = shalt.err (!%p3572_p4)
}
 0x227   : > { %s5148_s24 = scalar_lea.sflag [#allocation22], %s4205_s21  ;;  %s5149_s30 = sld [smem:[#allocation77_spill]] }
 0x228   : > { %2885 = dma.hbm_to_vmem [thread:$0]  (%p5139_p13), %s4591_s5, 16, %s860_s8, %s5148_s24  }
 0x229   : > { %s890_s2 = scalar_lea.vmem [#allocation26], %s4235_s15 }
 0x22a   : > { %s897_s12 = sshll.u32 %s890_s2, 4  ;;  %s898_s12 = int_to_ptr.vmem [resolvable:$true] %s897_s12 }
 0x22d   : > { %s4617_s19 = scalar_lea.hbm %s5149_s30, %s4289_s26  ;;  %s3580_s5 = scalar_lea.hbm %s5149_s30, 32 }
 0x22e   : > { %s3576_s22 = scalar_lea.hbm %s4617_s19, 16  ;;  %p3581_p0 = scmp.lt.u32.totalorder %s4617_s19, %s5149_s30 }
 0x22f   : > { %p3577_p3 = scmp.ne.s32.totalorder %s4617_s19, %s3576_s22  ;;  %p3582_p2 = scmp.lt.u32.totalorder %s3580_s5, %s3576_s22 }
 0x230   : > { %p3584_p6 = scmp.lt.u32.totalorder %s3576_s22, %s4617_s19 }
 0x231   : > { %p3578_p8 = pnand %p3577_p3, %p5139_p13  ;;  %p3583_p10 = por %p3582_p2, %p3581_p0 }
 0x233   : > { %p3579_p11 = pneg %p3578_p8  ;;  %p3585_p5 = por %p3584_p6, %p3583_p10 }
 0x235   : > { %p3586_p9 = pnand %p3585_p5, %p3579_p11 }
 0x237   : > { %3589 = shalt.err (!%p3586_p9)
}
 0x238   : > { %s3590_s0 = scalar_lea.vmem %s898_s12, 16  ;;  %s3845_s3 = smov [#allocation26]  }
 0x239   : > { %p3591_p1 = scmp.ne.s32.totalorder %s898_s12, %s3590_s0  ;;  %s3594_s2 = sshll.u32 %s3845_s3, 4  ;;  %s3595_s2 = int_to_ptr.vmem [resolvable:$false] %s3594_s2 }
 0x23a   : > { %s3596_s6 = scalar_lea.vmem %s3595_s2, 32  ;;  %p3597_p4 = scmp.lt.s32.totalorder %s898_s12, %s3595_s2 }
 0x23b   : > { %p3592_p7 = pnand %p3591_p1, %p5139_p13  ;;  %p3598_p3 = scmp.lt.s32.totalorder %s3596_s6, %s3590_s0 }
 0x23d   : > { %p3593_p12 = pneg %p3592_p7  ;;  %p3599_p8 = por %p3598_p3, %p3597_p4 }
 0x23f   : > { %p3600_p0 = pnand %p3599_p8, %p3593_p12 }
 0x241   : > { %3603 = shalt.err (!%p3600_p0)
}
 0x242   : > { %s5150_s22 = scalar_lea.sflag [#allocation25], %s4205_s21  ;;  %s5151_s8 = sld [smem:[#allocation79_spill]] }
 0x243   : > { %2887 = dma.hbm_to_vmem [thread:$0]  (%p5139_p13), %s4617_s19, 16, %s898_s12, %s5150_s22  }
 0x244   : > { %s924_s0 = scalar_lea.vmem [#allocation29], %s4235_s15 }
 0x245   : > { %s931_s3 = sshll.u32 %s924_s0, 4  ;;  %s932_s3 = int_to_ptr.vmem [resolvable:$true] %s931_s3 }
 0x248   : > { %s4643_s24 = scalar_lea.hbm %s5151_s8, %s4289_s26  ;;  %s3608_s19 = scalar_lea.hbm %s5151_s8, 32 }
 0x249   : > { %s3604_s2 = scalar_lea.hbm %s4643_s24, 16  ;;  %p3609_p6 = scmp.lt.u32.totalorder %s4643_s24, %s5151_s8 }
 0x24a   : > { %p3605_p11 = scmp.ne.s32.totalorder %s4643_s24, %s3604_s2  ;;  %p3610_p5 = scmp.lt.u32.totalorder %s3608_s19, %s3604_s2 }
 0x24b   : > { %p3612_p1 = scmp.lt.u32.totalorder %s3604_s2, %s4643_s24 }
 0x24c   : > { %p3606_p2 = pnand %p3605_p11, %p5139_p13  ;;  %p3611_p9 = por %p3610_p5, %p3609_p6 }
 0x24e   : > { %p3607_p10 = pneg %p3606_p2  ;;  %p3613_p7 = por %p3612_p1, %p3611_p9 }
 0x250   : > { %p3614_p12 = pnand %p3613_p7, %p3607_p10 }
 0x252   : > { %3617 = shalt.err (!%p3614_p12)
}
 0x253   : > { %s3618_s15 = scalar_lea.vmem %s932_s3, 16  ;;  %s3846_s26 = smov [#allocation29]  }
 0x254   : > { %p3619_p4 = scmp.ne.s32.totalorder %s932_s3, %s3618_s15  ;;  %s3622_s1 = sshll.u32 %s3846_s26, 4  ;;  %s3623_s1 = int_to_ptr.vmem [resolvable:$false] %s3622_s1 }
 0x255   : > { %s3624_s7 = scalar_lea.vmem %s3623_s1, 32  ;;  %p3625_p0 = scmp.lt.s32.totalorder %s932_s3, %s3623_s1 }
 0x256   : > { %p3620_p3 = pnand %p3619_p4, %p5139_p13  ;;  %p3626_p11 = scmp.lt.s32.totalorder %s3624_s7, %s3618_s15 }
 0x258   : > { %p3621_p8 = pneg %p3620_p3  ;;  %p3627_p2 = por %p3626_p11, %p3625_p0 }
 0x25a   : > { %p3628_p5 = pnand %p3627_p2, %p3621_p8 }
 0x25c   : > { %3631 = shalt.err (!%p3628_p5)
}
 0x25d   : > { %s5152_s5 = scalar_lea.sflag [#allocation28], %s4205_s21 }
 0x25e   : > { %2889 = dma.hbm_to_vmem [thread:$0]  (%p5139_p13), %s4643_s24, 16, %s932_s3, %s5152_s5  }
 0x25f PF: > { %s5153_s0 = sld [smem:[#allocation62_spill]] }
 0x265   : > { %p5154_p10 = scmp.ne.s32.totalorder %s5153_s0, 0 }
 0x266   : > { %s5155_s2 = sld [smem:[#allocation50_spill]] (!%p5154_p10)  ;;  %s5156_s6 = sld [smem:[#allocation56_spill]] (!%p5154_p10) }
 0x267   : > { %940 = sbr.rel (%p5154_p10) target bundleno = 4364 (0x110c), region = 96 }
 0x26c   : > { %s4668_s19 = sand.u32 (!%p5154_p10), 1, %s5155_s2   ;;  %p5157_p6 = scmp.ne.s32.totalorder (!%p5154_p10), %s5156_s6, 0 }
 0x26d   : > { %s4671_s12 = sshll.u32 (!%p5154_p10), %s4668_s19, 3  ;;  %s943_s22 = scalar_lea.sflag (!%p5154_p10), [#allocation4], %s4668_s19 }
 0x26e   : > { %s946_s15 = scalar_lea.vmem [#allocation3], %s4671_s12 }
 0x26f   : > { %3733 = dma.done.wait (%p5157_p6), %s943_s22, 128  }
 0x270   : > { %3735 = vsyncadd (%p5157_p6), %s943_s22, 4294967168  ;;  %s5158_s10 = sld [smem:[#allocation53_spill]] }
 0x276   : > { %s4680_s21 = sand.u32 1, %s5158_s10  }
 0x277   : > { %s952_s24 = scalar_lea.sflag [#allocation7], %s4680_s21 }
 0x278   : > { %3737 = dma.done.wait (%p5157_p6), %s952_s24, 144  }
 0x279   : > { %3739 = vsyncadd (%p5157_p6), %s952_s24, 4294967152  ;;  %p5159_p13 = scmp.eq.s32.totalorder %s5158_s10, 0 }
 0x27b   : > { %3741 = dma.done.wait (%p5159_p13), [#allocation10], 32   ;;  %p5160_p9 = pmov %p5159_p13 }
 0x27c   : > { %s5161_s1 = sld [smem:[#allocation48_spill]]  ;;  %s5162_s7 = sld [smem:[#allocation59_spill]] }
 0x27d   : > { %3743 = vsyncadd (%p5160_p9), [#allocation10], 4294967264  ;;  %s977_s2 = scalar_lea.sflag [#allocation13], %s4680_s21 }
 0x282   : > { %s4694_s5 = sand.u32 1, %s5161_s1   ;;  %p5163_p1 = scmp.ne.s32.totalorder %s5162_s7, 0 }
 0x283   : > { %s4697_s0 = sshll.u32 %s4694_s5, 4 }
 0x284   : > { %3745 = dma.done.wait (%p5163_p1), %s977_s2, 272  }
 0x285   : > { %3747 = vsyncadd (%p5163_p1), %s977_s2, 4294967024  ;;  %s994_s24 = scalar_lea.sflag [#allocation16], %s4680_s21 }
 0x286   : > { %3749 = dma.done.wait (%p5163_p1), %s994_s24, 272  }
 0x287   : > { %3751 = vsyncadd (%p5163_p1), %s994_s24, 4294967024  ;;  %s1011_s3 = scalar_lea.sflag [#allocation19], %s4680_s21 }
 0x288   : > { %3753 = dma.done.wait (%p5163_p1), %s1011_s3, 32  }
 0x289   : > { %3755 = vsyncadd (%p5163_p1), %s1011_s3, 4294967264  ;;  %s1027_s26 = scalar_lea.sflag [#allocation22], %s4680_s21 }
 0x28a   : > { %3757 = dma.done.wait (%p5163_p1), %s1027_s26, 272  }
 0x28b   : > { %3759 = vsyncadd (%p5163_p1), %s1027_s26, 4294967024  ;;  %s2687_s24 = sshll.u32 %s4694_s5, 5  ;;  %s1044_s1 = scalar_lea.sflag [#allocation25], %s4680_s21 }
 0x28c   : > { %s4729_s3 = scalar_lea.vmem [#allocation24], %s2687_s24 }
 0x28d   : > { %3761 = dma.done.wait (%p5163_p1), %s1044_s1, 528  }
 0x28e   : > { %3763 = vsyncadd (%p5163_p1), %s1044_s1, 4294966768  ;;  %s1061_s26 = scalar_lea.sflag [#allocation28], %s4680_s21  ;;  %s1063_s22 = scalar_lea.vmem [#allocation27], %s4694_s5 }
 0x28f   : > { %3765 = dma.done.wait (%p5163_p1), %s1061_s26, 32  }
 0x290   : > { %3767 = vsyncadd (%p5163_p1), %s1061_s26, 4294967264  ;;  %s1071_s24 = scalar_lea.vmem [#allocation29], %s4694_s5  ;;  %p5164_p7 = pmov %p5160_p9 }
 0x292   : > { %3769 = dma.done.wait (%p5164_p7), [#allocation31], 272   ;;  %p5165_p12 = pmov %p5164_p7 }
 0x293   : > { %s1194_s1 = scalar_lea.vmem [#allocation33], %s4671_s12  ;;  %s5067_s6 = scalar_lea.vmem [#allocation34], %s4671_s12 }
 0x294   : > { %3771 = vsyncadd (%p5165_p12), [#allocation31], 4294967024  ;;  %s5166_s2 = sld [smem:[#allocation51_spill]] }
 0x29a   : > { %p2692_p4 = scmp.ne.s32.totalorder %s5166_s2, 0 }
 0x29b   : > { %v1207_v0 = vld [vmem:[%s946_s15] sm:$0xff] (!%p2692_p4)  ;;  %vm1210_vm0 = vcmask (!%p2692_p4), 261120  }
 0x29c   : > { %1206 = sbr.rel (%p2692_p4) target bundleno = 982 (0x3d6), region = 176  ;;  %v1211_v1 = vsel (!%p2692_p4), %vm1210_vm0, %v1207_v0, 0.0  ;;  %v2693_v11 = vld [vmem:[#allocation9] ss:$0 sm:$0xff] (!%p2692_p4)  ;;  %v2694_v13 = vld [vmem:[#allocation11] ss:$0 sm:$0xff] (!%p2692_p4) }
 0x29d   : > { %1212 = vadd.xlane.f32.xlu0 (!%p2692_p4), %v1211_v1 }
 0x32a   : > { %v1213_v2 = vpop.xlane.xlu0 %1212 }
 0x32b   : > { %v1215_v3 = vmul.f32 0.03125, %v1213_v2 }
 0x32d   : > { %v1216_v4 = vsub.f32 %v1207_v0, %v1215_v3 }
 0x32f   : > { %v1217_v5 = vmul.f32 %v1216_v4, %v1216_v4 }
 0x331   : > { %v1218_v6 = vsel %vm1210_vm0, %v1217_v5, 0.0 }
 0x332   : > { %1219 = vadd.xlane.f32.xlu0 %v1218_v6 }
 0x3bf   : > { %v1220_v7 = vpop.xlane.xlu0 %1219 }
 0x3c0   : > { %v1221_v8 = vmul.f32 0.03125, %v1220_v7 }
 0x3c2   : > { %v1222_v9 = vadd.f32 1e-12, %v1221_v8 }
 0x3c4   : > { %3056 = vrsqrt.f32 %v1222_v9 }
 0x3ce   : > { %v3057_v10 = vpop.eup %3056 }
 0x3cf   : > { %v1224_v12 = vmul.f32 %v3057_v10, %v1216_v4 }
 0x3d1   : > { %v1231_v14 = vmul.f32 %v2693_v11, %v1224_v12 }
 0x3d3   : > { %v1238_v15 = vadd.f32 %v2694_v13, %v1231_v14 }
 0x3d5   : > { %1239 = vst.msk [vmem:[#allocation2] sm:$0xff] %vm1210_vm0, %v1238_v15 }
 0x3d6 PF: > { %s5167_s15 = scalar_lea.vmem [#allocation12], %s4697_s0  ;;  %v3847_v17 = vmov 0.0   ;;  %vm3848_vm1 = vmmov 0   ;;  %vm1265_vm2 = vcmask 261120   ;;  %s5169_s21 = scalar_lea.vmem [#allocation14], %s4694_s5  ;;  %vm1333_vm3 = vcmask 64512  }
 0x3d7   : > { %v3058_v16 = vld [vmem:[%s5167_s15] sm:$0xff]   ;;  %2775 = vmatprep.subr.bf16.mxu0 %v3847_v17  ;;  %2783 = vmatprep.subr.bf16.mxu1 %v3847_v17  ;;  %s5168_s10 = smov %s5167_s15  ;;  %s3849_s7 = smov 104   ;;  %vm1580_vm4 = vcmask 1043456   ;;  %vm1781_vm5 = vcmask 130048   ;;  %vm1783_vm6 = vcmask 195584   ;;  %vm2017_vm8 = vcmask 523264  }
 0x3d8   : > { %2776 = vmatpush3.bf16.msra.mxu0 %v3058_v16  ;;  %v3059_v18 = vld [vmem:[%s5168_s10 + $0x8] sm:$0xff]   ;;  %2779 = vmatprep.mubr.msk.bf16.mxu0 %vm3848_vm1, %v3847_v17  ;;  %v2695_v21 = vld [vmem:[%s5169_s21] ss:$0 sm:$0xff]  ;;  %s3850_s2 = smov 120   ;;  %s3851_s26 = smov 112  }
 0x3d9   : > { %2777 = vmatprep.subr.bf16.mxu0 %v3847_v17  ;;  %2785 = vmatprep.mubr.msk.bf16.mxu1 %vm3848_vm1, %v3847_v17  ;;  %s3852_s15 = smov 96   ;;  %s5170_s10 = scalar_lea.vmem [#allocation6], %s4668_s19 }
 0x3da   : > { %v2699_v42 = vld [vmem:[%s5170_s10] ss:$0 sm:$0xff]  ;;  %s3853_s21 = smov 64   ;;  %s3856_s10 = smov 24  }
 0x3dc   : > { %v4763_v19 = vld [vmem:[#allocation2] sm:$0xff]  ;;  %2778 = vmatpush3.bf16.msra.mxu0 %v3059_v18 }
 0x3dd   : > { %v1245_v20 = vpack.c.bf16 %v4763_v19, %v4763_v19  ;;  %2789 = vmatprep.subr.bf16.mxu0 %v3847_v17 }
 0x3df   : > { %2780 = vmatmul.mubr.msk.bf16.vlgmr.msra.gmra.mrb[0].mxu0 %vm1265_vm2, %v1245_v20 }
 0x3e0   : > { %2791 = vmatprep.mubr.msk.bf16.mxu0 %vm3848_vm1, %v3847_v17 }
 0x4b2   : > { %v1303_v22 = vpop.f32.mrb[0].mxu0 }
 0x4b3   : > { %v1304_v23 = vadd.f32 %v2695_v21, %v1303_v22  ;;  %v2781_v24 = vpop.f32.mrb[1].mxu0 }
 0x4b4   : > { %v1306_v25 = vpop.f32.mrb[2].mxu0 }
 0x4b5   : > { %1316 = vrot.lane.b32.xlu1 %v1304_v23, %s3849_s7  ;;  %1310 = vrot.lane.b32.xlu0 %v1304_v23, %s3850_s2  ;;  %v2782_v26 = vpop.f32.mrb[3].mxu0  ;;  %v4776_v27 = vpack.c.bf16 %v1304_v23, %v1304_v23  ;;  %s5171_s7 = scalar_lea.vmem [#allocation15], %s4697_s0 }
 0x4b6   : > { %s5172_s2 = smov %s5171_s7 }
 0x4b9   : > { %1313 = vrot.lane.b32.xlu0 %v1304_v23, %s3851_s26  ;;  %1331 = vrot.lane.b32.xlu1 %v4776_v27, %s3852_s15  ;;  %s3854_s26 = smov 8  }
 0x527   : > { %v1317_v28 = vpop.permute.xlu1 %1316  ;;  %v1311_v29 = vpop.permute.xlu0 %1310 }
 0x528   : > { %v1320_v30 = vpack.c.bf16 %v1311_v29, %v1311_v29  ;;  %v4779_v33 = vpack.c.bf16 %v1317_v28, %v1317_v28 }
 0x52a   : > { %1381 = vrot.lane.b32.xlu0 %v1320_v30, %s3852_s15 }
 0x52b   : > { %v1314_v31 = vpop.permute.xlu0 %1313  ;;  %v1332_v32 = vpop.permute.xlu1 %1331 }
 0x52c   : > { %v4781_v34 = vpack.c.bf16 %v1314_v31, %v1314_v31  ;;  %v1338_v35 = vsel %vm1333_vm3, %v1332_v32, 0 }
 0x52d   : > { %2784 = vmatpush3.bf16.xpose.msra.mxu1 %v1338_v35 }
 0x52e   : > { %1479 = vrot.lane.b32.xlu0 %v4779_v33, %s3852_s15  ;;  %1430 = vrot.lane.b32.xlu1 %v4781_v34, %s3852_s15  ;;  %s3855_s15 = smov 16  }
 0x52f   : > { %2795 = vmatprep.subr.bf16.mxu1 %v3847_v17 }
 0x534   : > { %2786 = vmatmul.mubr.msk.bf16.vlgmr.msra.gmra.mrb[0].mxu1 %vm1333_vm3, %v4776_v27 }
 0x535   : > { %2797 = vmatprep.mubr.msk.bf16.mxu1 %vm3848_vm1, %v3847_v17 }
 0x59c   : > { %v1382_v36 = vpop.permute.xlu0 %1381 }
 0x59d   : > { %v1387_v37 = vsel %vm1333_vm3, %v1382_v36, 0 }
 0x59e   : > { %2790 = vmatpush3.bf16.xpose.msra.mxu0 %v1387_v37 }
 0x59f   : > { %2801 = vmatprep.subr.bf16.mxu0 %v3847_v17 }
 0x5a0   : > { %v1431_v38 = vpop.permute.xlu1 %1430  ;;  %v1480_v40 = vpop.permute.xlu0 %1479 }
 0x5a1   : > { %v1436_v39 = vsel %vm1333_vm3, %v1431_v38, 0  ;;  %v1485_v41 = vsel %vm1333_vm3, %v1480_v40, 0 }
 0x5a2   : > { %2796 = vmatpush3.bf16.xpose.msra.mxu1 %v1436_v39 }
 0x5a3   : > { %2807 = vmatprep.subr.bf16.mxu1 %v3847_v17 }
 0x5a5   : > { %2792 = vmatmul.mubr.msk.bf16.vlgmr.msra.gmra.mrb[4].mxu0 %vm1333_vm3, %v1320_v30 }
 0x5a6   : > { %2802 = vmatpush3.bf16.xpose.msra.mxu0 %v1485_v41  ;;  %2803 = vmatprep.mubr.msk.bf16.mxu0 %vm3848_vm1, %v3847_v17 }
 0x5a7   : > { %2813 = vmatprep.subr.bf16.mxu0 %v3847_v17 }
 0x5a9   : > { %2798 = vmatmul.mubr.msk.bf16.vlgmr.msra.gmra.mrb[4].mxu1 %vm1333_vm3, %v4781_v34 }
 0x5aa   : > { %2809 = vmatprep.mubr.msk.bf16.mxu1 %vm3848_vm1, %v3847_v17 }
 0x5ad   : > { %2804 = vmatmul.mubr.msk.bf16.vlgmr.msra.gmra.mrb[8].mxu0 %vm1333_vm3, %v4779_v33 }
 0x5ae   : > { %2815 = vmatprep.mubr.msk.bf16.mxu0 %vm3848_vm1, %v3847_v17 }
 0x607   : > { %v1374_v43 = vpop.f32.mrb[0].mxu1 }
 0x608   : > { %v1375_v44 = vadd.f32 %v2699_v42, %v1374_v43  ;;  %v2787_v45 = vpop.f32.mrb[1].mxu1 }
 0x609   : > { %v1377_v46 = vpop.f32.mrb[2].mxu1 }
 0x60a   : > { %v2788_v47 = vpop.f32.mrb[3].mxu1  ;;  %v1527_v48 = vsel %vm1333_vm3, %v1375_v44, -inf }
 0x60b   : > { %1528 = vmax.xlane.f32.xlu1 %v1527_v48 }
 0x678   : > { %v1423_v49 = vpop.f32.mrb[4].mxu0 }
 0x679   : > { %v1424_v50 = vadd.f32 %v2699_v42, %v1423_v49  ;;  %v2793_v51 = vpop.f32.mrb[5].mxu0 }
 0x67a   : > { %v1426_v52 = vpop.f32.mrb[6].mxu0 }
 0x67b   : > { %v2794_v53 = vpop.f32.mrb[7].mxu0  ;;  %v1530_v54 = vsel %vm1333_vm3, %v1424_v50, -inf }
 0x67c   : > { %v1472_v55 = vpop.f32.mrb[4].mxu1  ;;  %1531 = vmax.xlane.f32.xlu0 %v1530_v54  ;;  %v3060_v53 = vld [vmem:[%s5171_s7] sm:$0xff]   ;;  %v3061_v54 = vld [vmem:[%s5172_s2 + $0x8] sm:$0xff]   ;;  %s5174_s7 = scalar_lea.vmem [#allocation21], %s4697_s0  ;;  %s5178_s0 = scalar_lea.vmem [#allocation23], %s4694_s5 }
 0x67d   : > { %v1473_v56 = vadd.f32 %v2699_v42, %v1472_v55  ;;  %v2799_v57 = vpop.f32.mrb[5].mxu1  ;;  %s5175_s2 = smov %s5174_s7 }
 0x67e   : > { %v1475_v58 = vpop.f32.mrb[6].mxu1 }
 0x67f   : > { %v2800_v59 = vpop.f32.mrb[7].mxu1  ;;  %v1533_v60 = vsel %vm1333_vm3, %v1473_v56, -inf }
 0x680   : > { %1534 = vmax.xlane.f32.xlu0 %v1533_v60  ;;  %v1521_v61 = vpop.f32.mrb[8].mxu0 }
 0x681   : > { %v1522_v62 = vadd.f32 %v2699_v42, %v1521_v61  ;;  %v2805_v63 = vpop.f32.mrb[9].mxu0 }
 0x682   : > { %v1524_v0 = vpop.f32.mrb[10].mxu0 }
 0x683   : > { %v2806_v1 = vpop.f32.mrb[11].mxu0  ;;  %v1536_v2 = vsel %vm1333_vm3, %v1522_v62, -inf }
 0x684   : > { %1537 = vmax.xlane.f32.xlu1 %v1536_v2 }
 0x695   : > { %1624 = vrot.lane.b32.xlu1 %v1320_v30, %s3853_s21 }
 0x696   : > { %1575 = vrot.lane.b32.xlu0 %v4776_v27, %s3853_s21 }
 0x698   : > { %v1529_v3 = vpop.xlane.xlu1 %1528 }
 0x699   : > { %v1539_v4 = vsub.f32 %v1375_v44, %v1529_v3 }
 0x69b   : > { %v1543_v5 = vmul.f32 1.442695, %v1539_v4 }
 0x69d   : > { %3068 = vpow2.f32 %v1543_v5 }
 0x6a7   : > { %v3069_v6 = vpop.eup %3068 }
 0x6a8   : > { %v1551_v7 = vsel %vm1333_vm3, %v3069_v6, 0.0 }
 0x6b5   : > { %1552 = vadd.xlane.f32.xlu0 %v1551_v7 }
 0x709   : > { %v1532_v8 = vpop.xlane.xlu0 %1531 }
 0x70a   : > { %v1540_v9 = vsub.f32 %v1424_v50, %v1532_v8 }
 0x70c   : > { %v1545_v10 = vmul.f32 1.442695, %v1540_v9 }
 0x70d   : > { %v1535_v11 = vpop.xlane.xlu0 %1534 }
 0x70e   : > { %3070 = vpow2.f32 %v1545_v10  ;;  %v1541_v12 = vsub.f32 %v1473_v56, %v1535_v11 }
 0x710   : > { %v1547_v13 = vmul.f32 1.442695, %v1541_v12 }
 0x711   : > { %v1576_v14 = vpop.permute.xlu0 %1575  ;;  %v1538_v15 = vpop.xlane.xlu1 %1537 }
 0x712   : > { %3072 = vpow2.f32 %v1547_v13  ;;  %v1582_v16 = vsel %vm1580_vm4, %v1576_v14, 0  ;;  %v1542_v18 = vsub.f32 %v1522_v62, %v1538_v15 }
 0x713   : > { %2808 = vmatpush3.bf16.msra.mxu1 %v1582_v16 }
 0x714   : > { %v1549_v20 = vmul.f32 1.442695, %v1542_v18  ;;  %2819 = vmatprep.subr.bf16.mxu1 %v3847_v17 }
 0x715   : > { %v1625_v21 = vpop.permute.xlu1 %1624 }
 0x716   : > { %3074 = vpow2.f32 %v1549_v20  ;;  %v1630_v22 = vsel %vm1580_vm4, %v1625_v21, 0 }
 0x717   : > { %2814 = vmatpush3.bf16.msra.mxu0 %v1630_v22 }
 0x718   : > { %v3071_v23 = vpop.eup %3070  ;;  %2825 = vmatprep.subr.bf16.mxu0 %v3847_v17 }
 0x719   : > { %v1554_v24 = vsel %vm1333_vm3, %v3071_v23, 0.0 }
 0x71a   : > { %1555 = vadd.xlane.f32.xlu1 %v1554_v24 }
 0x71c   : > { %v3073_v25 = vpop.eup %3072 }
 0x71d   : > { %v1557_v26 = vsel %vm1333_vm3, %v3073_v25, 0.0 }
 0x71e   : > { %1558 = vadd.xlane.f32.xlu0 %v1557_v26  ;;  %v3063_v26 = vld [vmem:[%s5175_s2 + $0x8] sm:$0xff]  }
 0x720   : > { %v3075_v27 = vpop.eup %3074 }
 0x721   : > { %v1560_v28 = vsel %vm1333_vm3, %v3075_v27, 0.0 }
 0x722   : > { %1561 = vadd.xlane.f32.xlu1 %v1560_v28 }
 0x733   : > { %1672 = vrot.lane.b32.xlu1 %v4781_v34, %s3853_s21 }
 0x734   : > { %1720 = vrot.lane.b32.xlu0 %v4779_v33, %s3853_s21  ;;  %s5173_s21 = scalar_lea.vmem [#allocation17], %s4694_s5 }
 0x735   : > { %v2708_v10 = vld [vmem:[%s5173_s21] ss:$0 sm:$0xff] }
 0x742   : > { %v1553_v29 = vpop.xlane.xlu0 %1552 }
 0x743   : > { %3076 = vrcp.f32 %v1553_v29 }
 0x74d   : > { %v3077_v30 = vpop.eup %3076 }
 0x74e   : > { %v1564_v31 = vmul.f32 %v3077_v30, %v3069_v6 }
 0x750   : > { %v1571_v32 = vpack.c.bf16 %v1564_v31, %v1564_v31 }
 0x752   : > { %2810 = vmatmul.mubr.msk.bf16.vlgmr.msra.gmra.mrb[8].mxu1 %vm1333_vm3, %v1571_v32 }
 0x753   : > { %2821 = vmatprep.mubr.msk.bf16.mxu1 %vm3848_vm1, %v3847_v17 }
 0x7a7   : > { %v1556_v35 = vpop.xlane.xlu1 %1555 }
 0x7a8   : > { %3078 = vrcp.f32 %v1556_v35 }
 0x7ab   : > { %v1559_v36 = vpop.xlane.xlu0 %1558 }
 0x7ac   : > { %3080 = vrcp.f32 %v1559_v36 }
 0x7af   : > { %v1562_v37 = vpop.xlane.xlu1 %1561  ;;  %v1721_v33 = vpop.permute.xlu0 %1720 }
 0x7b0   : > { %3082 = vrcp.f32 %v1562_v37  ;;  %v1726_v44 = vsel %vm1580_vm4, %v1721_v33, 0  ;;  %v3067_v33 = vld [vmem:[%s4729_s3 + $0x18] sm:$0xff]  }
 0x7b2   : > { %v3079_v34 = vpop.eup %3078 }
 0x7b3   : > { %v1566_v38 = vmul.f32 %v3079_v34, %v3071_v23  ;;  %v1673_v39 = vpop.permute.xlu1 %1672  ;;  %v3064_v34 = vld [vmem:[%s4729_s3] sm:$0xff]  }
 0x7b4   : > { %v1678_v40 = vsel %vm1580_vm4, %v1673_v39, 0  ;;  %v3066_v39 = vld [vmem:[%s4729_s3 + $0x10] sm:$0xff]  }
 0x7b5   : > { %2820 = vmatpush3.bf16.msra.mxu1 %v1678_v40  ;;  %v1572_v41 = vpack.c.bf16 %v1566_v38, %v1566_v38  ;;  %v3065_v38 = vld [vmem:[%s4729_s3 + $0x8] sm:$0xff]   ;;  %s5179_s3 = scalar_lea.vmem [#allocation26], %s4694_s5 }
 0x7b6   : > { %v3081_v42 = vpop.eup %3080  ;;  %2831 = vmatprep.subr.bf16.mxu1 %v3847_v17  ;;  %v2714_v40 = vld [vmem:[%s5178_s0] ss:$0 sm:$0xff] }
 0x7b7   : > { %v1568_v43 = vmul.f32 %v3081_v42, %v3073_v25  ;;  %2816 = vmatmul.mubr.msk.bf16.vlgmr.msra.gmra.mrb[12].mxu0 %vm1333_vm3, %v1572_v41  ;;  %v3062_v25 = vld [vmem:[%s5174_s7] sm:$0xff]  }
 0x7b8   : > { %2826 = vmatpush3.bf16.msra.mxu0 %v1726_v44  ;;  %2827 = vmatprep.mubr.msk.bf16.mxu0 %vm3848_vm1, %v3847_v17 }
 0x7b9   : > { %v1573_v45 = vpack.c.bf16 %v1568_v43, %v1568_v43  ;;  %2839 = vmatprep.subr.bf16.mxu0 %v3847_v17 }
 0x7ba   : > { %v3083_v46 = vpop.eup %3082 }
 0x7bb   : > { %v1570_v47 = vmul.f32 %v3083_v46, %v3075_v27  ;;  %2822 = vmatmul.mubr.msk.bf16.vlgmr.msra.gmra.mrb[12].mxu1 %vm1333_vm3, %v1573_v45 }
 0x7bc   : > { %2835 = vmatprep.mubr.msk.bf16.mxu1 %vm3848_vm1, %v3847_v17  ;;  %2832 = vmatpush3.bf16.msra.mxu1 %v3060_v53 }
 0x7bd   : > { %v1574_v48 = vpack.c.bf16 %v1570_v47, %v1570_v47  ;;  %2833 = vmatprep.subr.bf16.mxu1 %v3847_v17 }
 0x7bf   : > { %2828 = vmatmul.mubr.msk.bf16.vlgmr.msra.gmra.mrb[16].mxu0 %vm1333_vm3, %v1574_v48 }
 0x7c0   : > { %2843 = vmatprep.mubr.msk.bf16.mxu0 %vm3848_vm1, %v3847_v17  ;;  %2834 = vmatpush3.bf16.msra.mxu1 %v3061_v54 }
 0x7c1   : > { %2847 = vmatprep.subr.bf16.mxu1 %v3847_v17  ;;  %2840 = vmatpush3.bf16.msra.mxu0 %v3062_v25 }
 0x7c2   : > { %2841 = vmatprep.subr.bf16.mxu0 %v3847_v17 }
 0x7c5   : > { %2842 = vmatpush3.bf16.msra.mxu0 %v3063_v26 }
 0x825   : > { %v1618_v49 = vpop.f32.mrb[8].mxu1 }
 0x826   : > { %v2811_v50 = vpop.f32.mrb[9].mxu1 }
 0x827   : > { %v1621_v51 = vpop.f32.mrb[10].mxu1 }
 0x828   : > { %v2812_v52 = vpop.f32.mrb[11].mxu1 }
 0x88a   : > { %v1666_v55 = vpop.f32.mrb[12].mxu0 }
 0x88b   : > { %1769 = vrot.lane.b32.xlu1 %v1666_v55, %s3854_s26  ;;  %v2817_v56 = vpop.f32.mrb[13].mxu0  ;;  %s5176_s26 = scalar_lea.vmem [#allocation18], %s4694_s5 }
 0x88c   : > { %v1669_v57 = vpop.f32.mrb[14].mxu0  ;;  %v2712_v30 = vld [vmem:[%s5176_s26] ss:$0 sm:$0xff] }
 0x88d   : > { %v2818_v58 = vpop.f32.mrb[15].mxu0 }
 0x88e   : > { %v1714_v59 = vpop.f32.mrb[12].mxu1 }
 0x88f   : > { %1773 = vrot.lane.b32.xlu0 %v1714_v59, %s3855_s15  ;;  %v2823_v60 = vpop.f32.mrb[13].mxu1  ;;  %s5177_s15 = scalar_lea.vmem [#allocation20], %s4694_s5 }
 0x890   : > { %v1717_v61 = vpop.f32.mrb[14].mxu1  ;;  %v2713_v32 = vld [vmem:[%s5177_s15] ss:$0 sm:$0xff] }
 0x891   : > { %v2824_v62 = vpop.f32.mrb[15].mxu1 }
 0x892   : > { %v1762_v63 = vpop.f32.mrb[16].mxu0 }
 0x893   : > { %1777 = vrot.lane.b32.xlu1 %v1762_v63, %s3856_s10  ;;  %v2829_v0 = vpop.f32.mrb[17].mxu0  ;;  %s5180_s10 = sld [smem:[#allocation51_spill]] }
 0x894   : > { %v1765_v1 = vpop.f32.mrb[18].mxu0 }
 0x895   : > { %v2830_v2 = vpop.f32.mrb[19].mxu0  ;;  %v3857_v1 = vmov -1.0  }
 0x899   : > { %p2726_p3 = scmp.ne.s32.totalorder %s5180_s10, 1 }
 0x89a   : > { %vm3859_vm9 = vmmov (!%p2726_p3), 0   ;;  %s5181_s5 = scalar_lea.vmem (!%p2726_p3), [#allocation8], %s4671_s12  ;;  %vm2187_vm11 = vcmask (!%p2726_p3), 7168  }
 0x8fd   : > { %v1770_v3 = vpop.permute.xlu1 %1769 }
 0x8fe   : > { %v1780_v5 = vsel %vm1333_vm3, %v1618_v49, %v1770_v3 }
 0x901   : > { %v1774_v4 = vpop.permute.xlu0 %1773 }
 0x902   : > { %v1782_v6 = vsel %vm1781_vm5, %v1780_v5, %v1774_v4 }
 0x905   : > { %v1778_v7 = vpop.permute.xlu1 %1777 }
 0x906   : > { %v1784_v8 = vsel %vm1783_vm6, %v1782_v6, %v1778_v7 }
 0x907   : > { %v1789_v9 = vpack.c.bf16 %v1784_v8, %v1784_v8  ;;  %v2718_v8 = vld [vmem:[%s5179_s3] ss:$0 sm:$0xff] }
 0x909   : > { %2836 = vmatmul.mubr.msk.bf16.vlgmr.msra.gmra.mrb[16].mxu1 %vm1265_vm2, %v1789_v9 }
 0x90a   : > { %2855 = vmatprep.mubr.msk.bf16.mxu1 %vm3848_vm1, %v3847_v17  ;;  %2848 = vmatpush3.bf16.msra.mxu1 %v3064_v34 }
 0x90b   : > { %2849 = vmatprep.subr.bf16.mxu1 %v3847_v17 }
 0x90e   : > { %2850 = vmatpush3.bf16.msra.mxu1 %v3065_v38 }
 0x90f   : > { %2851 = vmatprep.subr.bf16.mxu1 %v3847_v17 }
 0x912   : > { %2852 = vmatpush3.bf16.msra.mxu1 %v3066_v39 }
 0x913   : > { %2853 = vmatprep.subr.bf16.mxu1 %v3847_v17 }
 0x916   : > { %2854 = vmatpush3.bf16.msra.mxu1 %v3067_v33 }
 0x9dc   : > { %v1846_v11 = vpop.f32.mrb[16].mxu1 }
 0x9dd   : > { %v1847_v12 = vadd.f32 %v2708_v10, %v1846_v11  ;;  %v2837_v13 = vpop.f32.mrb[17].mxu1 }
 0x9de   : > { %v1849_v14 = vpop.f32.mrb[18].mxu1 }
 0x9df   : > { %v2838_v15 = vpop.f32.mrb[19].mxu1  ;;  %v1852_v16 = vadd.f32 %v1847_v12, %v4763_v19 }
 0x9e1   : > { %v1855_v18 = vsel %vm1265_vm2, %v1852_v16, 0.0 }
 0x9e2   : > { %1856 = vadd.xlane.f32.xlu0 %v1855_v18 }
 0xa6f   : > { %v1857_v20 = vpop.xlane.xlu0 %1856 }
 0xa70   : > { %v1859_v21 = vmul.f32 0.03125, %v1857_v20 }
 0xa72   : > { %v1860_v22 = vsub.f32 %v1852_v16, %v1859_v21 }
 0xa74   : > { %v1861_v23 = vmul.f32 %v1860_v22, %v1860_v22 }
 0xa76   : > { %v1862_v24 = vsel %vm1265_vm2, %v1861_v23, 0.0 }
 0xa77   : > { %1863 = vadd.xlane.f32.xlu1 %v1862_v24 }
 0xb04   : > { %v1864_v19 = vpop.xlane.xlu1 %1863 }
 0xb05   : > { %v1865_v27 = vmul.f32 0.03125, %v1864_v19  ;;  %v2724_v19 = vld [vmem:[%s1063_s22] ss:$0 sm:$0xff] }
 0xb07   : > { %v1866_v28 = vadd.f32 1e-12, %v1865_v27 }
 0xb09   : > { %3084 = vrsqrt.f32 %v1866_v28  ;;  %v2725_v28 = vld [vmem:[%s1071_s24] ss:$0 sm:$0xff] }
 0xb13   : > { %v3085_v29 = vpop.eup %3084 }
 0xb14   : > { %v1868_v31 = vmul.f32 %v3085_v29, %v1860_v22 }
 0xb16   : > { %v1875_v35 = vmul.f32 %v2712_v30, %v1868_v31  ;;  %v3094_v31 = vld [vmem:[#allocation30] sm:$0xff] (!%p2726_p3)  }
 0xb18   : > { %v1882_v36 = vadd.f32 %v2713_v32, %v1875_v35  ;;  %v3858_v32 = vmov (!%p2726_p3), 0.0   ;;  %v3095_v35 = vld [vmem:[#allocation30 + $0x8] sm:$0xff] (!%p2726_p3)  }
 0xb19   : > { %2859 = vmatprep.subr.bf16.mxu0 (!%p2726_p3), %v3858_v32 }
 0xb1a   : > { %v1887_v37 = vpack.c.bf16 %v1882_v36, %v1882_v36 }
 0xb1c   : > { %2844 = vmatmul.mubr.msk.bf16.vlgmr.msra.gmra.mrb[20].mxu0 %vm1265_vm2, %v1887_v37  ;;  %v2727_v37 = vld [vmem:[#allocation32] ss:$0 sm:$0xff] (!%p2726_p3) }
 0xb1d   : > { %2860 = vmatpush3.bf16.msra.mxu0 (!%p2726_p3), %v3094_v31  ;;  %2863 = vmatprep.mubr.msk.bf16.mxu0 (!%p2726_p3), %vm3859_vm9, %v3858_v32 }
 0xb1e   : > { %2861 = vmatprep.subr.bf16.mxu0 (!%p2726_p3), %v3858_v32 }
 0xb21   : > { %2862 = vmatpush3.bf16.msra.mxu0 (!%p2726_p3), %v3095_v35 }
 0xbef   : > { %v1944_v41 = vpop.f32.mrb[20].mxu0 }
 0xbf0   : > { %v1945_v42 = vadd.f32 %v2714_v40, %v1944_v41  ;;  %v2845_v43 = vpop.f32.mrb[21].mxu0  ;;  %v2176_v41 = vld [vmem:[%s5181_s5] sm:$0xff] (!%p2726_p3) }
 0xbf1   : > { %v1947_v44 = vpop.f32.mrb[22].mxu0 }
 0xbf2   : > { %v1951_v45 = vmul.f32 0.70710677, %v1945_v42  ;;  %v2846_v46 = vpop.f32.mrb[23].mxu0  ;;  %v1950_v4 = vmul.f32 0.5, %v1945_v42  ;;  %v3860_v42 = vmov (!%p2726_p3), 0  }
 0xbf3   : > { %3092 = vset.pattern.permute.xlu1 (!%p2726_p3), %v3860_v42  ;;  %3093 = vset.pattern.permute.xlu0 (!%p2726_p3), %v3860_v42 }
 0xbf4   : > { %v1954_v47 = vand.u32 2147483647, %v1951_v45  ;;  %vm1952_vm7 = vcmp.ge.f32.partialorder %v1951_v45, 0.0  ;;  %2178 = vperm.xlu1 (!%p2726_p3), %3092, %v2176_v41  }
 0xbf5   : > { %v1953_v2 = vsel %vm1952_vm7, 1.0, %v3857_v1 }
 0xbf6   : > { %v1955_v48 = vmul.f32 0.3275911, %v1954_v47  ;;  %v1968_v50 = vsub.f32 0.0, %v1954_v47 }
 0xbf8   : > { %v1956_v49 = vadd.f32 1.0, %v1955_v48  ;;  %v1969_v52 = vmul.f32 %v1968_v50, %v1954_v47  ;;  %v2174_v48 = vlaneseq (!%p2726_p3) }
 0xbfa   : > { %3086 = vrcp.f32 %v1956_v49  ;;  %v1970_v17 = vmul.f32 1.442695, %v1969_v52  ;;  %v2175_v49 = vand.u32 (!%p2726_p3), 127, %v2174_v48 }
 0xbfc   : > { %3088 = vpow2.f32 %v1970_v17 }
 0xc04   : > { %v3087_v51 = vpop.eup %3086 }
 0xc05   : > { %v1959_v53 = vmul.f32 1.0614054, %v3087_v51 }
 0xc06   : > { %v3089_v62 = vpop.eup %3088 }
 0xc07   : > { %v1960_v54 = vadd.f32 -1.4531521, %v1959_v53 }
 0xc09   : > { %v1961_v55 = vmul.f32 %v3087_v51, %v1960_v54 }
 0xc0b   : > { %v1962_v56 = vadd.f32 1.4214138, %v1961_v55 }
 0xc0d   : > { %v1963_v57 = vmul.f32 %v3087_v51, %v1962_v56 }
 0xc0f   : > { %v1964_v58 = vadd.f32 -0.28449672, %v1963_v57 }
 0xc11   : > { %v1965_v59 = vmul.f32 %v3087_v51, %v1964_v58 }
 0xc13   : > { %v1966_v60 = vadd.f32 0.2548296, %v1965_v59 }
 0xc15   : > { %v1967_v61 = vmul.f32 %v3087_v51, %v1966_v60 }
 0xc17   : > { %v1972_v63 = vmul.f32 %v3089_v62, %v1967_v61 }
 0xc19   : > { %v1973_v0 = vsub.f32 1.0, %v1972_v63 }
 0xc1b   : > { %v1974_v3 = vmul.f32 %v1973_v0, %v1953_v2 }
 0xc1d   : > { %v1975_v5 = vadd.f32 1.0, %v1974_v3 }
 0xc1f   : > { %v1976_v6 = vmul.f32 %v1975_v5, %v1950_v4 }
 0xc21   : > { %v1985_v7 = vpack.c.bf16 %v1976_v6, %v1976_v6 }
 0xc23   : > { %2856 = vmatmul.mubr.msk.bf16.vlgmr.msra.gmra.mrb[20].mxu1 %vm2017_vm8, %v1985_v7 }
 0xc73   : > { %v2179_v50 = vpop.permute.xlu1 (!%p2726_p3), %2178 }
 0xc74   : > { %vm2180_vm10 = vcmp.eq.s32.totalorder (!%p2726_p3), %v2175_v49, %v2179_v50 }
 0xc75   : > { %v2731_v54 = vsel (!%p2726_p3), %vm2180_vm10, 1.0, %v3858_v32 }
 0xcf6   : > { %v2055_v9 = vpop.f32.mrb[20].mxu1 }
 0xcf7   : > { %v2056_v10 = vadd.f32 %v2718_v8, %v2055_v9  ;;  %v2857_v11 = vpop.f32.mrb[21].mxu1 }
 0xcf8   : > { %v2058_v12 = vpop.f32.mrb[22].mxu1 }
 0xcf9   : > { %v2858_v13 = vpop.f32.mrb[23].mxu1  ;;  %v2061_v14 = vadd.f32 %v2056_v10, %v1882_v36 }
 0xcfb   : > { %v2064_v15 = vsel %vm1265_vm2, %v2061_v14, 0.0 }
 0xcfc   : > { %2065 = vadd.xlane.f32.xlu0 %v2064_v15 }
 0xd89   : > { %v2066_v16 = vpop.xlane.xlu0 %2065 }
 0xd8a   : > { %v2067_v18 = vmul.f32 0.03125, %v2066_v16 }
 0xd8c   : > { %v2068_v20 = vsub.f32 %v2061_v14, %v2067_v18 }
 0xd8e   : > { %v2069_v21 = vmul.f32 %v2068_v20, %v2068_v20 }
 0xd90   : > { %v2070_v22 = vsel %vm1265_vm2, %v2069_v21, 0.0 }
 0xd91   : > { %2071 = vadd.xlane.f32.xlu0 %v2070_v22 }
 0xe1e   : > { %v2072_v23 = vpop.xlane.xlu0 %2071 }
 0xe1f   : > { %v2073_v24 = vmul.f32 0.03125, %v2072_v23 }
 0xe21   : > { %v2074_v25 = vadd.f32 1e-12, %v2073_v24 }
 0xe23   : > { %3090 = vrsqrt.f32 %v2074_v25 }
 0xe2d   : > { %v3091_v26 = vpop.eup %3090 }
 0xe2e   : > { %v2076_v27 = vmul.f32 %v3091_v26, %v2068_v20  ;;  %2095 = sbr.rel (%p2726_p3) target bundleno = 4313 (0x10d9), region = 180 }
 0xe30   : > { %v2083_v29 = vmul.f32 %v2724_v19, %v2076_v27 }
 0xe32   : > { %v2090_v30 = vadd.f32 %v2725_v28, %v2083_v29 }
 0xe34   : > { %2091 = vst.msk [vmem:[#allocation2] sm:$0xff] %vm1265_vm2, %v2090_v30  ;;  %v2100_v36 = vpack.c.bf16 (!%p2726_p3), %v2090_v30, %v2090_v30 }
 0xe36   : > { %2864 = vmatmul.mubr.msk.bf16.vlgmr.msra.gmra.mrb[0].mxu0 %vm1265_vm2, %v2100_v36 }
 0xf09   : > { %v2157_v34 = vpop.f32.mrb[0].mxu0 }
 0xf0a   : > { %v2158_v38 = vadd.f32 %v2727_v37, %v2157_v34  ;;  %v2865_v39 = vpop.f32.mrb[1].mxu0 }
 0xf0b   : > { %v2160_v33 = vpop.f32.mrb[2].mxu0 }
 0xf0c   : > { %2163 = vst [vmem:[%s1194_s1] sm:$0xff] %v2158_v38  ;;  %2164 = vmax.xlane.f32.xlu0 %v2158_v38  ;;  %v2866_v40 = vpop.f32.mrb[3].mxu0 }
 0xf99   : > { %v2165_v43 = vpop.xlane.xlu0 %2164 }
 0xf9a   : > { %v2166_v44 = vsub.f32 %v2158_v38, %v2165_v43 }
 0xf9c   : > { %v2167_v45 = vmul.f32 1.442695, %v2166_v44 }
 0xf9e   : > { %3096 = vpow2.f32 %v2167_v45 }
 0xfa8   : > { %v3097_v46 = vpop.eup %3096 }
 0xfa9   : > { %2169 = vadd.xlane.f32.xlu0 %v3097_v46 }
0x1036   : > { %v2170_v47 = vpop.xlane.xlu0 %2169 }
0x1037   : > { %3098 = vlog2.f32 %v2170_v47 }
0x1041   : > { %v3099_v51 = vpop.eup %3098 }
0x1042   : > { %v2172_v52 = vmul.f32 0.6931472, %v3099_v51 }
0x1044   : > { %v2173_v53 = vadd.f32 %v2172_v52, %v2165_v43 }
0x1046   : > { %v2183_v17 = vsub.f32 %v2173_v53, %v2158_v38 }
0x1048   : > { %v2184_v55 = vmul.f32 %v2731_v54, %v2183_v17 }
0x104a   : > { %2185 = vadd.xlane.f32.xlu1 %v2184_v55 }
0x10d7   : > { %v2186_v56 = vpop.xlane.xlu1 %2185 }
0x10d8   : > { %2188 = vst.msk [vmem:[%s5067_s6] sm:$0xff] %vm2187_vm11, %v2186_v56 }
0x10d9 PF: > { %s5182_s22 = sld [smem:[#allocation52_spill]]  ;;  %s5183_s24 = sld [smem:[#allocation60_spill]] }
0x10da   : > { %s5184_s26 = sld [smem:[#allocation80_spill]]  ;;  %s2208_s3 = sshll.u32 %s1194_s1, 4  ;;  %s2209_s3 = int_to_ptr.vmem [resolvable:$true] %s2208_s3 }
0x10db   : > { %s2190_s10 = scalar_lea.sflag [#allocation5], %s4668_s19  ;;  %s3632_s5 = scalar_lea.vmem %s2209_s3, 128 }
0x10dc   : > { %p3633_p8 = scmp.ne.s32.totalorder %s2209_s3, %s3632_s5  ;;  %s3861_s6 = smov [#allocation33]  }
0x10dd   : > { %s3636_s8 = sshll.u32 %s3861_s6, 4  ;;  %s3637_s8 = int_to_ptr.vmem [resolvable:$false] %s3636_s8 }
0x10de   : > { %s3638_s9 = scalar_lea.vmem %s3637_s8, 256  ;;  %p3639_p5 = scmp.lt.s32.totalorder %s2209_s3, %s3637_s8 }
0x10df   : > { %s2734_s21 = sshll.u32 %s5182_s22, 7  ;;  %p5186_p0 = scmp.ne.s32.totalorder %s5183_s24, 0 }
0x10e0   : > { %s5185_s15 = smov %s5184_s26  ;;  %s4902_s0 = scalar_lea.hbm %s5184_s26, %s2734_s21 }
0x10e1   : > { %p3634_p11 = pnand %p3633_p8, %p5186_p0  ;;  %p3640_p10 = scmp.lt.s32.totalorder %s3638_s9, %s3632_s5 }
0x10e3   : > { %p3635_p2 = pneg %p3634_p11  ;;  %p3641_p6 = por %p3640_p10, %p3639_p5 }
0x10e5   : > { %p3642_p13 = pnand %p3641_p6, %p3635_p2 }
0x10e7   : > { %3645 = shalt.err (!%p3642_p13)
}
0x10e8   : > { %s3646_s1 = scalar_lea.hbm %s4902_s0, 128  ;;  %s3650_s6 = scalar_lea.hbm %s5185_s15, 256 }
0x10e9   : > { %p3647_p9 = scmp.ne.s32.totalorder %s4902_s0, %s3646_s1  ;;  %p3651_p12 = scmp.lt.u32.totalorder %s4902_s0, %s5185_s15 }
0x10ea   : > { %p3652_p4 = scmp.lt.u32.totalorder %s3650_s6, %s3646_s1  ;;  %p3654_p8 = scmp.lt.u32.totalorder %s3646_s1, %s4902_s0 }
0x10eb   : > { %p3648_p1 = pnand %p3647_p9, %p5186_p0 }
0x10ec   : > { %p3653_p3 = por %p3652_p4, %p3651_p12 }
0x10ed   : > { %p3649_p7 = pneg %p3648_p1 }
0x10ee   : > { %p3655_p11 = por %p3654_p8, %p3653_p3 }
0x10f0   : > { %p3656_p2 = pnand %p3655_p11, %p3649_p7 }
0x10f2   : > { %3659 = shalt.err (!%p3656_p2)
}
0x10f3   : > { %2913 = dma.vmem_to_hbm [thread:$0]  (%p5186_p0), %s2209_s3, 128, %s4902_s0, %s2190_s10  }
0x10f4   : > { %s5187_s7 = sld [smem:[#allocation81_spill]]  ;;  %s5188_s6 = scalar_lea.vmem [#allocation34], %s4671_s12 }
0x10f5   : > { %s2221_s26 = sshll.u32 %s5188_s6, 4  ;;  %s2195_s1 = scalar_lea.sflag [#allocation35], %s4668_s19  ;;  %s2222_s26 = int_to_ptr.vmem [resolvable:$true] %s2221_s26 }
0x10f6   : > { %s3660_s8 = scalar_lea.vmem %s2222_s26, 128  ;;  %s3862_s11 = smov [#allocation34]  }
0x10f7   : > { %p3661_p5 = scmp.ne.s32.totalorder %s2222_s26, %s3660_s8  ;;  %s3664_s13 = sshll.u32 %s3862_s11, 4  ;;  %s3665_s13 = int_to_ptr.vmem [resolvable:$false] %s3664_s13 }
0x10f8   : > { %s3666_s14 = scalar_lea.vmem %s3665_s13, 256  ;;  %p3667_p13 = scmp.lt.s32.totalorder %s2222_s26, %s3665_s13 }
0x10f9   : > { %p3662_p10 = pnand %p3661_p5, %p5186_p0  ;;  %p3668_p9 = scmp.lt.s32.totalorder %s3666_s14, %s3660_s8 }
0x10fa   : > { %s4929_s2 = scalar_lea.hbm %s5187_s7, %s2734_s21 }
0x10fb   : > { %p3663_p6 = pneg %p3662_p10  ;;  %p3669_p1 = por %p3668_p9, %p3667_p13 }
0x10fd   : > { %p3670_p7 = pnand %p3669_p1, %p3663_p6 }
0x10ff   : > { %3673 = shalt.err (!%p3670_p7)
}
0x1100   : > { %s3674_s19 = scalar_lea.hbm %s4929_s2, 128  ;;  %s3678_s11 = scalar_lea.hbm %s5187_s7, 256 }
0x1101   : > { %p3675_p12 = scmp.ne.s32.totalorder %s4929_s2, %s3674_s19  ;;  %p3679_p8 = scmp.lt.u32.totalorder %s4929_s2, %s5187_s7 }
0x1102   : > { %p3680_p11 = scmp.lt.u32.totalorder %s3678_s11, %s3674_s19  ;;  %p3682_p5 = scmp.lt.u32.totalorder %s3674_s19, %s4929_s2 }
0x1103   : > { %p3676_p4 = pnand %p3675_p12, %p5186_p0 }
0x1104   : > { %p3681_p2 = por %p3680_p11, %p3679_p8 }
0x1105   : > { %p3677_p3 = pneg %p3676_p4 }
0x1106   : > { %p3683_p10 = por %p3682_p5, %p3681_p2 }
0x1108   : > { %p3684_p6 = pnand %p3683_p10, %p3677_p3 }
0x110a   : > { %3687 = shalt.err (!%p3684_p6)
}
0x110b   : > { %2914 = dma.vmem_to_hbm [thread:$0]  (%p5186_p0), %s2222_s26, 128, %s4929_s2, %s2195_s1  }
0x110c PF: > { %s5189_s14 = sld [smem:[#allocation49_spill]]  ;;  %s5190_s0 = sld [smem:[#allocation61_spill]] }
0x110d   : > { %p2945_p13 = scmp.ge.s32.totalorder %s3822_s4, 2 }
0x1112   : > { %s2233_s3 = sand.u32 1, %s5189_s14   ;;  %p5191_p9 = scmp.ne.s32.totalorder %s5190_s0, 0 }
0x1113   : > { %s2234_s10 = scalar_lea.sflag [#allocation5], %s2233_s3 }
0x1114   : > { %p2931_p1 = pnand %p2945_p13, %p5191_p9 }
0x1116   : > { %3773 = dma.done.wait (!%p2931_p1), %s2234_s10, 128  }
0x1117   : > { %3775 = vsyncadd (!%p2931_p1), %s2234_s10, 4294967168  ;;  %s2243_s9 = scalar_lea.sflag [#allocation35], %s2233_s3 }
0x1118   : > { %3777 = dma.done.wait (!%p2931_p1), %s2243_s9, 128  }
0x1119   : > { %3779 = vsyncadd (!%p2931_p1), %s2243_s9, 4294967168  ;;  %s63_s4 = sadd.s32 1, %s3822_s4   ;;  %s5192_s1 = sld [smem:[#allocation48_spill]] }
0x111a   : > { %p60_p7 = scmp.ge.s32.totalorder %s63_s4, 6   ;;  %s5193_s24 = sld [smem:[#allocation57_spill]] }
0x111b   : > { %s5194_s5 = sld [smem:[#allocation50_spill]]  ;;  %s5195_s6 = sld [smem:[#allocation58_spill]] }
0x111c   : > { %s5196_s8 = sld [smem:[#allocation54_spill]]  ;;  %s5197_s19 = sld [smem:[#allocation55_spill]] }
0x111d   : > { %s5198_s22 = smov %s3790_s23  ;;  %s5201_s2 = smov %s3802_s25 }
0x111e   : > { %s5203_s3 = smov %s3814_s27  ;;  %s5204_s26 = smov %s3818_s28 }
0x111f   :  { %62 = sbr.rel (!%p60_p7) target bundleno = 47 (0x2f), region = 350 }
0x1120   : > { %s5199_s23 = smov %s5193_s24 }
0x1121   : > { %s5200_s24 = smov %s5194_s5  ;;  %s5202_s25 = smov %s5195_s6 }
0x1122   : > { %s5205_s27 = smov %s5196_s8  ;;  %s5206_s28 = smov %s5197_s19 }
0x1126   :  { %2248 = vsyncpa [#allocation4], 1 }
0x1127   :  { %2250 = vsyncpa [#allocation4 + $0x1], 1 }
0x1128   :  { %2251 = vsyncpa [#allocation7], 1 }
0x1129   :  { %2253 = vsyncpa [#allocation7 + $0x1], 1 }
0x112a   :  { %2254 = vsyncpa [#allocation10], 1 }
0x112b   :  { %2255 = vsyncpa [#allocation13], 1 }
0x112c   :  { %2257 = vsyncpa [#allocation13 + $0x1], 1 }
0x112d   :  { %2258 = vsyncpa [#allocation16], 1 }
0x112e   :  { %2260 = vsyncpa [#allocation16 + $0x1], 1 }
0x112f   :  { %2261 = vsyncpa [#allocation19], 1 }
0x1130   :  { %2263 = vsyncpa [#allocation19 + $0x1], 1 }
0x1131   :  { %2264 = vsyncpa [#allocation22], 1 }
0x1132   :  { %2266 = vsyncpa [#allocation22 + $0x1], 1 }
0x1133   :  { %2267 = vsyncpa [#allocation25], 1 }
0x1134   :  { %2269 = vsyncpa [#allocation25 + $0x1], 1 }
0x1135   :  { %2270 = vsyncpa [#allocation28], 1 }
0x1136   :  { %2272 = vsyncpa [#allocation28 + $0x1], 1 }
0x1137   :  { %2273 = vsyncpa [#allocation31], 1 }
0x1138   :  { %2274 = vsyncpa [#allocation5], 1 }
0x1139   :  { %2276 = vsyncpa [#allocation5 + $0x1], 1 }
0x113a   :  { %2277 = vsyncpa [#allocation35], 1 }
0x113b   :  { %2279 = vsyncpa [#allocation35 + $0x1], 1 }

</bundles_post_ra>
